<compile_context>
chip_gen: v6e
topology: v6e:2x2x1
jax: 0.10.0
libtpu: 0.0.40
codegen_flags: <defaults>
</compile_context>

<pallas_src>
import functools
import math

import jax
import jax.numpy as jnp
from jax.experimental import pallas as pl
from jax.experimental.pallas import tpu as pltpu


# --------------------------------------------------------------------------- helpers
def _round_up(x, m):
    return ((x + m - 1) // m) * m


def _pad2(x, rows, cols):
    r, c = x.shape
    if r == rows and c == cols:
        return x
    return jnp.pad(x, ((0, rows - r), (0, cols - c)))


def _row_col_tiles(n, k_dim, tile_m, tile_k):
    """Pick (tile_m, n_pad, tile_k_eff, k_pad) respecting the (8,128) block rules."""
    tile_m = _round_up(max(8, min(tile_m, _round_up(n, 8))), 8)
    n_pad = _round_up(n, tile_m)
    if k_dim <= tile_k:
        tile_k_eff, k_pad = k_dim, k_dim          # full K: single reduction step
    else:
        tile_k_eff = tile_k                       # default 512 (multiple of 128)
        k_pad = _round_up(k_dim, tile_k_eff)
    return tile_m, n_pad, tile_k_eff, k_pad


def _gelu_new(x):
    # HF "gelu_new": tanh approximation (EUP-friendly, no erf lowering needed)
    return 0.5 * x * (1.0 + jnp.tanh(
        math.sqrt(2.0 / math.pi) * (x + 0.044715 * x * x * x)))


_VMEM_LIMIT = 48 * 1024 * 1024  # explicit budget; fits v7x (64 MiB) with headroom


# --------------------------------------------------------------------------- kernel 1
def _fused_linear_kernel(x_ref, w_ref, b_ref, o_ref, acc_ref, *, n_k, act):
    k = pl.program_id(1)

    @pl.when(k == 0)
    def _():
        acc_ref[...] = jnp.zeros_like(acc_ref)

    acc_ref[...] += jnp.dot(x_ref[...], w_ref[...],
                            preferred_element_type=jnp.float32)

    @pl.when(k == n_k - 1)
    def _():
        y = acc_ref[...] + b_ref[...].astype(jnp.float32)
        if act == "gelu_new":
            y = _gelu_new(y)
        elif act == "relu":
            y = jnp.maximum(y, 0.0)
        o_ref[...] = y.astype(o_ref.dtype)


def fused_linear(x, w_t, b, *, act=None, tile_m=256, tile_k=512,
                 mxu_dtype=None, out_dtype=None):
    """act(x @ w_t + b).  x: [N, K], w_t: [K, H] (torch weight.T), b: [H]."""
    n, k_dim = x.shape
    h = w_t.shape[1]
    out_dtype = out_dtype or x.dtype
    if mxu_dtype is not None:
        x = x.astype(mxu_dtype)
        w_t = w_t.astype(mxu_dtype)

    tile_m, n_pad, tile_k, k_pad = _row_col_tiles(n, k_dim, tile_m, tile_k)
    x_p = _pad2(x, n_pad, k_pad)
    w_p = _pad2(w_t, k_pad, h)
    b2 = b.reshape(1, h)
    grid = (n_pad // tile_m, k_pad // tile_k)

    kernel = functools.partial(_fused_linear_kernel, n_k=grid[1], act=act)
    cost = pl.CostEstimate(
        flops=2 * n_pad * k_pad * h,
        transcendentals=(n_pad * h) if act == "gelu_new" else 0,
        bytes_accessed=(n_pad * k_pad + k_pad * h + n_pad * h + h) * 4)

    out = pl.pallas_call(
        kernel,
        out_shape=jax.ShapeDtypeStruct((n_pad, h), out_dtype),
        grid_spec=pltpu.PrefetchScalarGridSpec(
            num_scalar_prefetch=0,
            grid=grid,
            in_specs=[
                pl.BlockSpec((tile_m, tile_k), lambda i, j: (i, j)),   # activations
                pl.BlockSpec((tile_k, h), lambda i, j: (j, 0)),        # weight K-block (streamed)
                pl.BlockSpec((1, h), lambda i, j: (0, 0)),             # bias (resident)
            ],
            out_specs=pl.BlockSpec((tile_m, h), lambda i, j: (i, 0)),
            scratch_shapes=[pltpu.VMEM((tile_m, h), jnp.float32)],
        ),
        compiler_params=pltpu.CompilerParams(
            dimension_semantics=("parallel", "arbitrary"),
            vmem_limit_bytes=_VMEM_LIMIT),
        cost_estimate=cost,
    )(x_p, w_p, b2)
    return out[:n]


# --------------------------------------------------------------------------- kernel 2
def _attention_kernel(q_ref, k_ref, v_ref, m_ref, o_ref, *, scale):
    q = q_ref[...].astype(jnp.float32)              # (1, S, Dh)
    k = k_ref[...].astype(jnp.float32)
    s = jnp.einsum("bqd,bkd->bqk", q, k,
                   preferred_element_type=jnp.float32) * scale
    s = s + m_ref[...]                              # (1, 1, S) additive mask
    s = s - jnp.max(s, axis=-1, keepdims=True)
    p = jnp.exp(s)
    p = p / jnp.sum(p, axis=-1, keepdims=True)
    # TODO(synk): attention-prob dropout & head_mask (inference path: identity)
    o = jnp.einsum("bqk,bkd->bqd", p.astype(v_ref.dtype), v_ref[...],
                   preferred_element_type=jnp.float32)
    o_ref[...] = o.astype(o_ref.dtype)


def attention_core(q, k, v, add_mask, *, scale):
    """q,k,v: [B*H, S, Dh]; add_mask: [B*H, 1, S] additive mask."""
    bh, s, dh = q.shape
    kernel = functools.partial(_attention_kernel, scale=scale)
    return pl.pallas_call(
        kernel,
        out_shape=jax.ShapeDtypeStruct((bh, s, dh), q.dtype),
        grid_spec=pltpu.PrefetchScalarGridSpec(
            num_scalar_prefetch=0,
            grid=(bh,),
            in_specs=[
                pl.BlockSpec((1, s, dh), lambda i: (i, 0, 0)),
                pl.BlockSpec((1, s, dh), lambda i: (i, 0, 0)),
                pl.BlockSpec((1, s, dh), lambda i: (i, 0, 0)),
                pl.BlockSpec((1, 1, s), lambda i: (i, 0, 0)),
            ],
            out_specs=pl.BlockSpec((1, s, dh), lambda i: (i, 0, 0)),
        ),
        compiler_params=pltpu.CompilerParams(
            dimension_semantics=("parallel",)),
    )(q, k, v, add_mask)


# --------------------------------------------------------------------------- kernel 3
def _dense_res_ln_kernel(x_ref, res_ref, w_ref, b_ref, g_ref, beta_ref,
                         o_ref, acc_ref, *, n_k, eps):
    k = pl.program_id(1)

    @pl.when(k == 0)
    def _():
        acc_ref[...] = jnp.zeros_like(acc_ref)

    acc_ref[...] += jnp.dot(x_ref[...], w_ref[...],
                            preferred_element_type=jnp.float32)

    @pl.when(k == n_k - 1)
    def _():
        # dense bias + (dropout == identity) + residual add + LayerNorm, all in f32
        z = (acc_ref[...] + b_ref[...].astype(jnp.float32)
             + res_ref[...].astype(jnp.float32))
        mean = jnp.mean(z, axis=-1, keepdims=True)
        zc = z - mean
        var = jnp.mean(zc * zc, axis=-1, keepdims=True)
        inv = jax.lax.rsqrt(var + eps)
        out = zc * inv * g_ref[...].astype(jnp.float32) + beta_ref[...].astype(jnp.float32)
        o_ref[...] = out.astype(o_ref.dtype)


def dense_res_layernorm(x, residual, w_t, b, gamma, beta, *, eps,
                        tile_m=256, tile_k=512, mxu_dtype=None):
    """LayerNorm(x @ w_t + b + residual). x: [N, K], residual: [N, H], w_t: [K, H]."""
    n, k_dim = x.shape
    h = residual.shape[1]
    out_dtype = residual.dtype
    if mxu_dtype is not None:
        x = x.astype(mxu_dtype)
        w_t = w_t.astype(mxu_dtype)

    tile_m, n_pad, tile_k, k_pad = _row_col_tiles(n, k_dim, tile_m, tile_k)
    x_p = _pad2(x, n_pad, k_pad)
    res_p = _pad2(residual, n_pad, h)
    w_p = _pad2(w_t, k_pad, h)
    b2, g2, be2 = b.reshape(1, h), gamma.reshape(1, h), beta.reshape(1, h)
    grid = (n_pad // tile_m, k_pad // tile_k)

    kernel = functools.partial(_dense_res_ln_kernel, n_k=grid[1], eps=eps)
    cost = pl.CostEstimate(
        flops=2 * n_pad * k_pad * h + 10 * n_pad * h,
        transcendentals=n_pad,  # rsqrt per row
        bytes_accessed=(n_pad * k_pad + k_pad * h + 2 * n_pad * h + 3 * h) * 4)

    out = pl.pallas_call(
        kernel,
        out_shape=jax.ShapeDtypeStruct((n_pad, h), out_dtype),
        grid_spec=pltpu.PrefetchScalarGridSpec(
            num_scalar_prefetch=0,
            grid=grid,
            in_specs=[
                pl.BlockSpec((tile_m, tile_k), lambda i, j: (i, j)),   # activations
                pl.BlockSpec((tile_m, h), lambda i, j: (i, 0)),        # residual (resident over K)
                pl.BlockSpec((tile_k, h), lambda i, j: (j, 0)),        # weight K-block (streamed)
                pl.BlockSpec((1, h), lambda i, j: (0, 0)),             # bias
                pl.BlockSpec((1, h), lambda i, j: (0, 0)),             # LN gamma
                pl.BlockSpec((1, h), lambda i, j: (0, 0)),             # LN beta
            ],
            out_specs=pl.BlockSpec((tile_m, h), lambda i, j: (i, 0)),
            scratch_shapes=[pltpu.VMEM((tile_m, h), jnp.float32)],
        ),
        compiler_params=pltpu.CompilerParams(
            dimension_semantics=("parallel", "arbitrary"),
            vmem_limit_bytes=_VMEM_LIMIT),
        cost_estimate=cost,
    )(x_p, res_p, w_p, b2, g2, be2)
    return out[:n]


# --------------------------------------------------------------------------- encoder
def smith_layer(x, p, *, num_heads, eps, add_mask, tile_m, tile_k, mxu_dtype):
    b, s, h = x.shape
    n = b * s
    dh = h // num_heads
    x2 = x.reshape(n, h)

    lin = functools.partial(fused_linear, tile_m=tile_m, tile_k=tile_k,
                            mxu_dtype=mxu_dtype)

    # Fused QKV projection: single pallas_call, x is read once.
    w_qkv = jnp.concatenate([p["wq"], p["wk"], p["wv"]], axis=1)   # [H, 3H]
    b_qkv = jnp.concatenate([p["bq"], p["bk"], p["bv"]], axis=0)   # [3H]
    qkv = lin(x2, w_qkv, b_qkv)
    q, k, v = qkv[:, :h], qkv[:, h:2 * h], qkv[:, 2 * h:]

    def to_heads(t):
        return (t.reshape(b, s, num_heads, dh)
                 .transpose(0, 2, 1, 3)
                 .reshape(b * num_heads, s, dh))

    mask_bh = jnp.broadcast_to(add_mask[:, None, :, :],
                               (b, num_heads, 1, s)).reshape(b * num_heads, 1, s)
    ctx = attention_core(to_heads(q), to_heads(k), to_heads(v), mask_bh,
                         scale=1.0 / math.sqrt(dh))
    ctx = (ctx.reshape(b, num_heads, s, dh)
              .transpose(0, 2, 1, 3)
              .reshape(n, h))

    attn_out = dense_res_layernorm(ctx, x2, p["wo"], p["bo"],
                                   p["ln1_g"], p["ln1_b"], eps=eps,
                                   tile_m=tile_m, tile_k=tile_k,
                                   mxu_dtype=mxu_dtype)
    inter = lin(attn_out, p["wi"], p["bi"], act="gelu_new")
    out = dense_res_layernorm(inter, attn_out, p["wout"], p["bout"],
                              p["ln2_g"], p["ln2_b"], eps=eps,
                              tile_m=tile_m, tile_k=tile_k,
                              mxu_dtype=mxu_dtype)
    return out.reshape(b, s, h)


def smith_encoder(hidden_states, params, *, num_heads, eps,
                  attention_mask=None, tile_m=256, tile_k=512, mxu_dtype=None):
    """hidden_states: [B, S, H]; params: list of per-layer dicts (torch-weight.T layout)."""
    b, s, _ = hidden_states.shape
    if attention_mask is None:
        add_mask = jnp.zeros((b, 1, s), jnp.float32)
    else:
        add_mask = ((1.0 - attention_mask.astype(jnp.float32)) * -10000.0)[:, None, :]
    x = hidden_states
    for p in params:
        x = smith_layer(x, p, num_heads=num_heads, eps=eps, add_mask=add_mask,
                        tile_m=tile_m, tile_k=tile_k, mxu_dtype=mxu_dtype)
    return x


# --------------------------------------------------------------------------- reference
def _reference_encoder(hidden_states, params, *, num_heads, eps, attention_mask=None):
    b, s, h = hidden_states.shape
    dh = h // num_heads
    if attention_mask is None:
        add_mask = jnp.zeros((b, 1, 1, s), jnp.float32)
    else:
        add_mask = ((1.0 - attention_mask.astype(jnp.float32)) * -10000.0)[:, None, None, :]

    def ln(x, g, bta):
        mean = jnp.mean(x, axis=-1, keepdims=True)
        var = jnp.mean((x - mean) ** 2, axis=-1, keepdims=True)
        return (x - mean) * jax.lax.rsqrt(var + eps) * g + bta

    x = hidden_states
    for p in params:
        q = x @ p["wq"] + p["bq"]
        k = x @ p["wk"] + p["bk"]
        v = x @ p["wv"] + p["bv"]

        def heads(t):
            return t.reshape(b, s, num_heads, dh).transpose(0, 2, 1, 3)

        qh, kh, vh = heads(q), heads(k), heads(v)
        scores = jnp.einsum("bhqd,bhkd->bhqk", qh, kh) / math.sqrt(dh) + add_mask
        probs = jax.nn.softmax(scores, axis=-1)
        ctx = jnp.einsum("bhqk,bhkd->bhqd", probs, vh)
        ctx = ctx.transpose(0, 2, 1, 3).reshape(b, s, h)

        attn_out = ln(ctx @ p["wo"] + p["bo"] + x, p["ln1_g"], p["ln1_b"])
        inter = _gelu_new(attn_out @ p["wi"] + p["bi"])
        x = ln(inter @ p["wout"] + p["bout"] + attn_out, p["ln2_g"], p["ln2_b"])
    return x


# --------------------------------------------------------------------------- demo
if __name__ == "__main__":
    batch, seq = 2, 8
    hidden_size = 32
    num_heads = 2
    intermediate_size = 64
    num_layers = 2
    eps = 1e-12

    key = jax.random.PRNGKey(0)
    key, k_in = jax.random.split(key)
    hidden_states = jax.random.normal(k_in, (batch, seq, hidden_size), jnp.float32)

    params = []
    for _ in range(num_layers):
        keys = jax.random.split(key, 13)
        key = keys[0]

        def w(kk, shape):
            return 0.05 * jax.random.normal(kk, shape, jnp.float32)

        params.append({
            "wq": w(keys[1], (hidden_size, hidden_size)),
            "bq": w(keys[2], (hidden_size,)),
            "wk": w(keys[3], (hidden_size, hidden_size)),
            "bk": w(keys[4], (hidden_size,)),
            "wv": w(keys[5], (hidden_size, hidden_size)),
            "bv": w(keys[6], (hidden_size,)),
            "wo": w(keys[7], (hidden_size, hidden_size)),
            "bo": w(keys[8], (hidden_size,)),
            "ln1_g": 1.0 + 0.1 * jax.random.normal(keys[9], (hidden_size,), jnp.float32),
            "ln1_b": 0.05 * jax.random.normal(keys[10], (hidden_size,), jnp.float32),
            "wi": w(keys[11], (hidden_size, intermediate_size)),
            "bi": 0.01 * jnp.ones((intermediate_size,), jnp.float32),
            "wout": w(keys[12], (intermediate_size, hidden_size)),
            "bout": jnp.zeros((hidden_size,), jnp.float32),
            "ln2_g": jnp.ones((hidden_size,), jnp.float32),
            "ln2_b": jnp.zeros((hidden_size,), jnp.float32),
        })

    # jit the full encoder so each pallas_call is traced & compiled exactly once.
    encoder_fn = jax.jit(functools.partial(smith_encoder,
                                           num_heads=num_heads, eps=eps))
    out = encoder_fn(hidden_states, params)
    out = jax.block_until_ready(out)

    ref = _reference_encoder(hidden_states, params, num_heads=num_heads, eps=eps)
    assert out.shape == (batch, seq, hidden_size)
    err = jnp.max(jnp.abs(out - ref))
    assert jnp.allclose(out, ref, atol=1e-4, rtol=1e-4), f"mismatch vs reference: {err}"

    print("KERNEL_OK")
</pallas_src>

<mosaic_0001>
module attributes {stable_mosaic.version = 11 : i64} {
  func.func @_fused_linear_kernel(%arg0: i32, %arg1: i32, %arg2: memref<16x32xf32, #tpu.memory_space<vmem>>, %arg3: memref<32x96xf32, #tpu.memory_space<vmem>>, %arg4: memref<1x96xf32, #tpu.memory_space<vmem>>, %arg5: memref<16x96xf32, #tpu.memory_space<vmem>>, %arg6: memref<16x96xf32, #tpu.memory_space<vmem>>) attributes {dimension_semantics = [#tpu.dimension_semantics<parallel>, #tpu.dimension_semantics<arbitrary>], iteration_bounds = array<i64: 1, 1>, scalar_prefetch = 0 : i64, scratch_operands = 1 : i64, tpu.core_type = #tpu.core_type<tc>, window_params = [{transform_indices = @transform_0, window_bounds = array<i64: 16, 32>}, {transform_indices = @transform_1, window_bounds = array<i64: 32, 96>}, {pipeline_mode = #tpu.pipeline_mode<synchronous>, transform_indices = @transform_2, window_bounds = array<i64: 1, 96>}, {transform_indices = @transform_3, window_bounds = array<i64: 16, 96>}]} {
    %c0_i32 = arith.constant 0 : i32
    %0 = arith.cmpi eq, %arg1, %c0_i32 : i32
    %1 = arith.extui %0 : i1 to i32
    %c0_i32_0 = arith.constant 0 : i32
    %2 = arith.cmpi ne, %1, %c0_i32_0 : i32
    scf.if %2 {
      %cst_10 = arith.constant 0.000000e+00 : f32
      %12 = vector.broadcast %cst_10 : f32 to vector<16x96xf32>
      %c0_11 = arith.constant 0 : index
      %c0_12 = arith.constant 0 : index
      %13 = vector.load %arg6[%c0_11, %c0_12] : memref<16x96xf32, #tpu.memory_space<vmem>>, vector<16x96xf32>
      tpu.vector_store %arg6[%c0_11, %c0_12], %12 {strides = array<i32>} : memref<16x96xf32, #tpu.memory_space<vmem>>, vector<16x96xf32>,
    } else {
    }
    %c0 = arith.constant 0 : index
    %c0_1 = arith.constant 0 : index
    %3 = vector.load %arg6[%c0, %c0_1] : memref<16x96xf32, #tpu.memory_space<vmem>>, vector<16x96xf32>
    %c0_2 = arith.constant 0 : index
    %c0_3 = arith.constant 0 : index
    %4 = vector.load %arg2[%c0_2, %c0_3] : memref<16x32xf32, #tpu.memory_space<vmem>>, vector<16x32xf32>
    %c0_4 = arith.constant 0 : index
    %c0_5 = arith.constant 0 : index
    %5 = vector.load %arg3[%c0_4, %c0_5] : memref<32x96xf32, #tpu.memory_space<vmem>>, vector<32x96xf32>
    %cst = arith.constant dense<0.000000e+00> : vector<16x96xf32>
    %6 = tpu.matmul %4, %5, %cst {dimension_numbers = #tpu.dot_dimension_numbers<[1], [0], [0], [1], [0, 0, 1, 1], [], []>} : vector<16x32xf32>, vector<32x96xf32>, vector<16x96xf32> -> vector<16x96xf32>
    %7 = arith.addf %3, %6 : vector<16x96xf32>
    %c0_6 = arith.constant 0 : index
    %c0_7 = arith.constant 0 : index
    %8 = vector.load %arg6[%c0_6, %c0_7] : memref<16x96xf32, #tpu.memory_space<vmem>>, vector<16x96xf32>
    tpu.vector_store %arg6[%c0_6, %c0_7], %7 {strides = array<i32>} : memref<16x96xf32, #tpu.memory_space<vmem>>, vector<16x96xf32>,
    %c0_i32_8 = arith.constant 0 : i32
    %9 = arith.cmpi eq, %arg1, %c0_i32_8 : i32
    %10 = arith.extui %9 : i1 to i32
    %c0_i32_9 = arith.constant 0 : i32
    %11 = arith.cmpi ne, %10, %c0_i32_9 : i32
    scf.if %11 {
      %c0_10 = arith.constant 0 : index
      %c0_11 = arith.constant 0 : index
      %12 = vector.load %arg6[%c0_10, %c0_11] : memref<16x96xf32, #tpu.memory_space<vmem>>, vector<16x96xf32>
      %c0_12 = arith.constant 0 : index
      %c0_13 = arith.constant 0 : index
      %13 = vector.load %arg4[%c0_12, %c0_13] : memref<1x96xf32, #tpu.memory_space<vmem>>, vector<1x96xf32>
      %14 = vector.broadcast %13 : vector<1x96xf32> to vector<16x96xf32>
      %15 = arith.addf %12, %14 : vector<16x96xf32>
      %c0_14 = arith.constant 0 : index
      %c0_15 = arith.constant 0 : index
      %16 = vector.load %arg5[%c0_14, %c0_15] : memref<16x96xf32, #tpu.memory_space<vmem>>, vector<16x96xf32>
      tpu.vector_store %arg5[%c0_14, %c0_15], %15 {strides = array<i32>} : memref<16x96xf32, #tpu.memory_space<vmem>>, vector<16x96xf32>,
    } else {
    }
    return
  }
  func.func @transform_0(%arg0: i32, %arg1: i32) -> (i32, i32) {
    %c0_i32 = arith.constant 0 : i32
    return %arg0, %arg1 : i32, i32
  }
  func.func @transform_1(%arg0: i32, %arg1: i32) -> (i32, i32) {
    %c0_i32 = arith.constant 0 : i32
    %c0_i32_0 = arith.constant 0 : i32
    return %arg1, %c0_i32 : i32, i32
  }
  func.func @transform_2(%arg0: i32, %arg1: i32) -> (i32, i32) {
    %c0_i32 = arith.constant 0 : i32
    %c0_i32_0 = arith.constant 0 : i32
    %c0_i32_1 = arith.constant 0 : i32
    return %c0_i32, %c0_i32_0 : i32, i32
  }
  func.func @transform_3(%arg0: i32, %arg1: i32) -> (i32, i32) {
    %c0_i32 = arith.constant 0 : i32
    %c0_i32_0 = arith.constant 0 : i32
    return %arg0, %c0_i32 : i32, i32
  }
}

module attributes {stable_mosaic.version = 11 : i64} {
  func.func @_attention_kernel(%arg0: i32, %arg1: memref<1x8x16xf32, #tpu.memory_space<vmem>>, %arg2: memref<1x8x16xf32, #tpu.memory_space<vmem>>, %arg3: memref<1x8x16xf32, #tpu.memory_space<vmem>>, %arg4: memref<1x1x8xf32, #tpu.memory_space<vmem>>, %arg5: memref<1x8x16xf32, #tpu.memory_space<vmem>>) attributes {dimension_semantics = [#tpu.dimension_semantics<parallel>], iteration_bounds = array<i64: 4>, scalar_prefetch = 0 : i64, scratch_operands = 0 : i64, tpu.core_type = #tpu.core_type<tc>, window_params = [{transform_indices = @transform_0, window_bounds = array<i64: 1, 8, 16>}, {transform_indices = @transform_1, window_bounds = array<i64: 1, 8, 16>}, {transform_indices = @transform_2, window_bounds = array<i64: 1, 8, 16>}, {transform_indices = @transform_3, window_bounds = array<i64: 1, 1, 8>}, {transform_indices = @transform_4, window_bounds = array<i64: 1, 8, 16>}]} {
    %c0 = arith.constant 0 : index
    %c0_0 = arith.constant 0 : index
    %c0_1 = arith.constant 0 : index
    %0 = vector.load %arg1[%c0, %c0_0, %c0_1] : memref<1x8x16xf32, #tpu.memory_space<vmem>>, vector<1x8x16xf32>
    %c0_2 = arith.constant 0 : index
    %c0_3 = arith.constant 0 : index
    %c0_4 = arith.constant 0 : index
    %1 = vector.load %arg2[%c0_2, %c0_3, %c0_4] : memref<1x8x16xf32, #tpu.memory_space<vmem>>, vector<1x8x16xf32>
    "tpu.trace_start"() <{level = 10 : i32, message = "bqd,bkd->bqk"}> : () -> ()
    %cst = arith.constant dense<0.000000e+00> : vector<1x8x8xf32>
    %2 = tpu.matmul %0, %1, %cst {dimension_numbers = #tpu.dot_dimension_numbers<[2], [2], [1], [1], [0, 0, 0, 1, 1, 1], [0], [0]>} : vector<1x8x16xf32>, vector<1x8x16xf32>, vector<1x8x8xf32> -> vector<1x8x8xf32>
    "tpu.trace_stop"() : () -> ()
    %cst_5 = arith.constant 2.500000e-01 : f32
    %3 = vector.broadcast %cst_5 : f32 to vector<1x8x8xf32>
    %4 = arith.mulf %2, %3 : vector<1x8x8xf32>
    %c0_6 = arith.constant 0 : index
    %c0_7 = arith.constant 0 : index
    %c0_8 = arith.constant 0 : index
    %5 = vector.load %arg4[%c0_6, %c0_7, %c0_8] : memref<1x1x8xf32, #tpu.memory_space<vmem>>, vector<1x1x8xf32>
    %6 = vector.broadcast %5 : vector<1x1x8xf32> to vector<1x8x8xf32>
    %7 = arith.addf %4, %6 : vector<1x8x8xf32>
    %cst_9 = arith.constant dense<0xFF800000> : vector<1x8xf32>
    %8 = vector.multi_reduction <maximumf>, %7, %cst_9 [2] : vector<1x8x8xf32> to vector<1x8xf32>
    %9 = vector.shape_cast %8 : vector<1x8xf32> to vector<1x8x1xf32>
    %10 = vector.broadcast %9 : vector<1x8x1xf32> to vector<1x8x8xf32>
    %11 = arith.subf %7, %10 : vector<1x8x8xf32>
    %12 = math.exp %11 : vector<1x8x8xf32>
    %cst_10 = arith.constant dense<0.000000e+00> : vector<1x8xf32>
    %13 = vector.multi_reduction <add>, %12, %cst_10 [2] : vector<1x8x8xf32> to vector<1x8xf32>
    %14 = vector.shape_cast %13 : vector<1x8xf32> to vector<1x8x1xf32>
    %15 = vector.broadcast %14 : vector<1x8x1xf32> to vector<1x8x8xf32>
    %16 = arith.divf %12, %15 : vector<1x8x8xf32>
    %c0_11 = arith.constant 0 : index
    %c0_12 = arith.constant 0 : index
    %c0_13 = arith.constant 0 : index
    %17 = vector.load %arg3[%c0_11, %c0_12, %c0_13] : memref<1x8x16xf32, #tpu.memory_space<vmem>>, vector<1x8x16xf32>
    "tpu.trace_start"() <{level = 10 : i32, message = "bqk,bkd->bqd"}> : () -> ()
    %cst_14 = arith.constant dense<0.000000e+00> : vector<1x8x16xf32>
    %18 = tpu.matmul %16, %17, %cst_14 {dimension_numbers = #tpu.dot_dimension_numbers<[2], [1], [1], [2], [0, 0, 0, 1, 1, 2], [0], [0]>} : vector<1x8x8xf32>, vector<1x8x16xf32>, vector<1x8x16xf32> -> vector<1x8x16xf32>
    "tpu.trace_stop"() : () -> ()
    %c0_15 = arith.constant 0 : index
    %c0_16 = arith.constant 0 : index
    %c0_17 = arith.constant 0 : index
    %19 = vector.load %arg5[%c0_15, %c0_16, %c0_17] : memref<1x8x16xf32, #tpu.memory_space<vmem>>, vector<1x8x16xf32>
    tpu.vector_store %arg5[%c0_15, %c0_16, %c0_17], %18 {strides = array<i32>} : memref<1x8x16xf32, #tpu.memory_space<vmem>>, vector<1x8x16xf32>,
    return
  }
  func.func @transform_0(%arg0: i32) -> (i32, i32, i32) {
    %c0_i32 = arith.constant 0 : i32
    %c0_i32_0 = arith.constant 0 : i32
    %c0_i32_1 = arith.constant 0 : i32
    return %arg0, %c0_i32, %c0_i32_0 : i32, i32, i32
  }
  func.func @transform_1(%arg0: i32) -> (i32, i32, i32) {
    %c0_i32 = arith.constant 0 : i32
    %c0_i32_0 = arith.constant 0 : i32
    %c0_i32_1 = arith.constant 0 : i32
    return %arg0, %c0_i32, %c0_i32_0 : i32, i32, i32
  }
  func.func @transform_2(%arg0: i32) -> (i32, i32, i32) {
    %c0_i32 = arith.constant 0 : i32
    %c0_i32_0 = arith.constant 0 : i32
    %c0_i32_1 = arith.constant 0 : i32
    return %arg0, %c0_i32, %c0_i32_0 : i32, i32, i32
  }
  func.func @transform_3(%arg0: i32) -> (i32, i32, i32) {
    %c0_i32 = arith.constant 0 : i32
    %c0_i32_0 = arith.constant 0 : i32
    %c0_i32_1 = arith.constant 0 : i32
    return %arg0, %c0_i32, %c0_i32_0 : i32, i32, i32
  }
  func.func @transform_4(%arg0: i32) -> (i32, i32, i32) {
    %c0_i32 = arith.constant 0 : i32
    %c0_i32_0 = arith.constant 0 : i32
    %c0_i32_1 = arith.constant 0 : i32
    return %arg0, %c0_i32, %c0_i32_0 : i32, i32, i32
  }
}

module attributes {stable_mosaic.version = 11 : i64} {
  func.func @_dense_res_ln_kernel(%arg0: i32, %arg1: i32, %arg2: memref<16x32xf32, #tpu.memory_space<vmem>>, %arg3: memref<16x32xf32, #tpu.memory_space<vmem>>, %arg4: memref<32x32xf32, #tpu.memory_space<vmem>>, %arg5: memref<1x32xf32, #tpu.memory_space<vmem>>, %arg6: memref<1x32xf32, #tpu.memory_space<vmem>>, %arg7: memref<1x32xf32, #tpu.memory_space<vmem>>, %arg8: memref<16x32xf32, #tpu.memory_space<vmem>>, %arg9: memref<16x32xf32, #tpu.memory_space<vmem>>) attributes {dimension_semantics = [#tpu.dimension_semantics<parallel>, #tpu.dimension_semantics<arbitrary>], iteration_bounds = array<i64: 1, 1>, scalar_prefetch = 0 : i64, scratch_operands = 1 : i64, tpu.core_type = #tpu.core_type<tc>, window_params = [{transform_indices = @transform_0, window_bounds = array<i64: 16, 32>}, {transform_indices = @transform_1, window_bounds = array<i64: 16, 32>}, {transform_indices = @transform_2, window_bounds = array<i64: 32, 32>}, {pipeline_mode = #tpu.pipeline_mode<synchronous>, transform_indices = @transform_3, window_bounds = array<i64: 1, 32>}, {pipeline_mode = #tpu.pipeline_mode<synchronous>, transform_indices = @transform_4, window_bounds = array<i64: 1, 32>}, {pipeline_mode = #tpu.pipeline_mode<synchronous>, transform_indices = @transform_5, window_bounds = array<i64: 1, 32>}, {transform_indices = @transform_6, window_bounds = array<i64: 16, 32>}]} {
    %c0_i32 = arith.constant 0 : i32
    %0 = arith.cmpi eq, %arg1, %c0_i32 : i32
    %1 = arith.extui %0 : i1 to i32
    %c0_i32_0 = arith.constant 0 : i32
    %2 = arith.cmpi ne, %1, %c0_i32_0 : i32
    scf.if %2 {
      %cst_10 = arith.constant 0.000000e+00 : f32
      %12 = vector.broadcast %cst_10 : f32 to vector<16x32xf32>
      %c0_11 = arith.constant 0 : index
      %c0_12 = arith.constant 0 : index
      %13 = vector.load %arg9[%c0_11, %c0_12] : memref<16x32xf32, #tpu.memory_space<vmem>>, vector<16x32xf32>
      tpu.vector_store %arg9[%c0_11, %c0_12], %12 {strides = array<i32>} : memref<16x32xf32, #tpu.memory_space<vmem>>, vector<16x32xf32>,
    } else {
    }
    %c0 = arith.constant 0 : index
    %c0_1 = arith.constant 0 : index
    %3 = vector.load %arg9[%c0, %c0_1] : memref<16x32xf32, #tpu.memory_space<vmem>>, vector<16x32xf32>
    %c0_2 = arith.constant 0 : index
    %c0_3 = arith.constant 0 : index
    %4 = vector.load %arg2[%c0_2, %c0_3] : memref<16x32xf32, #tpu.memory_space<vmem>>, vector<16x32xf32>
    %c0_4 = arith.constant 0 : index
    %c0_5 = arith.constant 0 : index
    %5 = vector.load %arg4[%c0_4, %c0_5] : memref<32x32xf32, #tpu.memory_space<vmem>>, vector<32x32xf32>
    %cst = arith.constant dense<0.000000e+00> : vector<16x32xf32>
    %6 = tpu.matmul %4, %5, %cst {dimension_numbers = #tpu.dot_dimension_numbers<[1], [0], [0], [1], [0, 0, 1, 1], [], []>} : vector<16x32xf32>, vector<32x32xf32>, vector<16x32xf32> -> vector<16x32xf32>
    %7 = arith.addf %3, %6 : vector<16x32xf32>
    %c0_6 = arith.constant 0 : index
    %c0_7 = arith.constant 0 : index
    %8 = vector.load %arg9[%c0_6, %c0_7] : memref<16x32xf32, #tpu.memory_space<vmem>>, vector<16x32xf32>
    tpu.vector_store %arg9[%c0_6, %c0_7], %7 {strides = array<i32>} : memref<16x32xf32, #tpu.memory_space<vmem>>, vector<16x32xf32>,
    %c0_i32_8 = arith.constant 0 : i32
    %9 = arith.cmpi eq, %arg1, %c0_i32_8 : i32
    %10 = arith.extui %9 : i1 to i32
    %c0_i32_9 = arith.constant 0 : i32
    %11 = arith.cmpi ne, %10, %c0_i32_9 : i32
    scf.if %11 {
      %c0_10 = arith.constant 0 : index
      %c0_11 = arith.constant 0 : index
      %12 = vector.load %arg9[%c0_10, %c0_11] : memref<16x32xf32, #tpu.memory_space<vmem>>, vector<16x32xf32>
      %c0_12 = arith.constant 0 : index
      %c0_13 = arith.constant 0 : index
      %13 = vector.load %arg5[%c0_12, %c0_13] : memref<1x32xf32, #tpu.memory_space<vmem>>, vector<1x32xf32>
      %14 = vector.broadcast %13 : vector<1x32xf32> to vector<16x32xf32>
      %15 = arith.addf %12, %14 : vector<16x32xf32>
      %c0_14 = arith.constant 0 : index
      %c0_15 = arith.constant 0 : index
      %16 = vector.load %arg3[%c0_14, %c0_15] : memref<16x32xf32, #tpu.memory_space<vmem>>, vector<16x32xf32>
      %17 = arith.addf %15, %16 : vector<16x32xf32>
      %cst_16 = arith.constant dense<0.000000e+00> : vector<16xf32>
      %18 = vector.multi_reduction <add>, %17, %cst_16 [1] : vector<16x32xf32> to vector<16xf32>
      %19 = vector.shape_cast %18 : vector<16xf32> to vector<16x1xf32>
      %cst_17 = arith.constant 3.200000e+01 : f32
      %20 = vector.broadcast %cst_17 : f32 to vector<16x1xf32>
      %21 = arith.divf %19, %20 : vector<16x1xf32>
      %22 = vector.broadcast %21 : vector<16x1xf32> to vector<16x32xf32>
      %23 = arith.subf %17, %22 : vector<16x32xf32>
      %24 = arith.mulf %23, %23 : vector<16x32xf32>
      %cst_18 = arith.constant dense<0.000000e+00> : vector<16xf32>
      %25 = vector.multi_reduction <add>, %24, %cst_18 [1] : vector<16x32xf32> to vector<16xf32>
      %26 = vector.shape_cast %25 : vector<16xf32> to vector<16x1xf32>
      %cst_19 = arith.constant 3.200000e+01 : f32
      %27 = vector.broadcast %cst_19 : f32 to vector<16x1xf32>
      %28 = arith.divf %26, %27 : vector<16x1xf32>
      %cst_20 = arith.constant 9.99999996E-13 : f32
      %29 = vector.broadcast %cst_20 : f32 to vector<16x1xf32>
      %30 = arith.addf %28, %29 : vector<16x1xf32>
      %31 = math.rsqrt %30 : vector<16x1xf32>
      %32 = vector.broadcast %31 : vector<16x1xf32> to vector<16x32xf32>
      %33 = arith.mulf %23, %32 : vector<16x32xf32>
      %c0_21 = arith.constant 0 : index
      %c0_22 = arith.constant 0 : index
      %34 = vector.load %arg6[%c0_21, %c0_22] : memref<1x32xf32, #tpu.memory_space<vmem>>, vector<1x32xf32>
      %35 = vector.broadcast %34 : vector<1x32xf32> to vector<16x32xf32>
      %36 = arith.mulf %33, %35 : vector<16x32xf32>
      %c0_23 = arith.constant 0 : index
      %c0_24 = arith.constant 0 : index
      %37 = vector.load %arg7[%c0_23, %c0_24] : memref<1x32xf32, #tpu.memory_space<vmem>>, vector<1x32xf32>
      %38 = vector.broadcast %37 : vector<1x32xf32> to vector<16x32xf32>
      %39 = arith.addf %36, %38 : vector<16x32xf32>
      %c0_25 = arith.constant 0 : index
      %c0_26 = arith.constant 0 : index
      %40 = vector.load %arg8[%c0_25, %c0_26] : memref<16x32xf32, #tpu.memory_space<vmem>>, vector<16x32xf32>
      tpu.vector_store %arg8[%c0_25, %c0_26], %39 {strides = array<i32>} : memref<16x32xf32, #tpu.memory_space<vmem>>, vector<16x32xf32>,
    } else {
    }
    return
  }
  func.func @transform_0(%arg0: i32, %arg1: i32) -> (i32, i32) {
    %c0_i32 = arith.constant 0 : i32
    return %arg0, %arg1 : i32, i32
  }
  func.func @transform_1(%arg0: i32, %arg1: i32) -> (i32, i32) {
    %c0_i32 = arith.constant 0 : i32
    %c0_i32_0 = arith.constant 0 : i32
    return %arg0, %c0_i32 : i32, i32
  }
  func.func @transform_2(%arg0: i32, %arg1: i32) -> (i32, i32) {
    %c0_i32 = arith.constant 0 : i32
    %c0_i32_0 = arith.constant 0 : i32
    return %arg1, %c0_i32 : i32, i32
  }
  func.func @transform_3(%arg0: i32, %arg1: i32) -> (i32, i32) {
    %c0_i32 = arith.constant 0 : i32
    %c0_i32_0 = arith.constant 0 : i32
    %c0_i32_1 = arith.constant 0 : i32
    return %c0_i32, %c0_i32_0 : i32, i32
  }
  func.func @transform_4(%arg0: i32, %arg1: i32) -> (i32, i32) {
    %c0_i32 = arith.constant 0 : i32
    %c0_i32_0 = arith.constant 0 : i32
    %c0_i32_1 = arith.constant 0 : i32
    return %c0_i32, %c0_i32_0 : i32, i32
  }
  func.func @transform_5(%arg0: i32, %arg1: i32) -> (i32, i32) {
    %c0_i32 = arith.constant 0 : i32
    %c0_i32_0 = arith.constant 0 : i32
    %c0_i32_1 = arith.constant 0 : i32
    return %c0_i32, %c0_i32_0 : i32, i32
  }
  func.func @transform_6(%arg0: i32, %arg1: i32) -> (i32, i32) {
    %c0_i32 = arith.constant 0 : i32
    %c0_i32_0 = arith.constant 0 : i32
    return %arg0, %c0_i32 : i32, i32
  }
}

module attributes {stable_mosaic.version = 11 : i64} {
  func.func @_fused_linear_kernel(%arg0: i32, %arg1: i32, %arg2: memref<16x32xf32, #tpu.memory_space<vmem>>, %arg3: memref<32x64xf32, #tpu.memory_space<vmem>>, %arg4: memref<1x64xf32, #tpu.memory_space<vmem>>, %arg5: memref<16x64xf32, #tpu.memory_space<vmem>>, %arg6: memref<16x64xf32, #tpu.memory_space<vmem>>) attributes {dimension_semantics = [#tpu.dimension_semantics<parallel>, #tpu.dimension_semantics<arbitrary>], iteration_bounds = array<i64: 1, 1>, scalar_prefetch = 0 : i64, scratch_operands = 1 : i64, tpu.core_type = #tpu.core_type<tc>, window_params = [{transform_indices = @transform_0, window_bounds = array<i64: 16, 32>}, {transform_indices = @transform_1, window_bounds = array<i64: 32, 64>}, {pipeline_mode = #tpu.pipeline_mode<synchronous>, transform_indices = @transform_2, window_bounds = array<i64: 1, 64>}, {transform_indices = @transform_3, window_bounds = array<i64: 16, 64>}]} {
    %c0_i32 = arith.constant 0 : i32
    %0 = arith.cmpi eq, %arg1, %c0_i32 : i32
    %1 = arith.extui %0 : i1 to i32
    %c0_i32_0 = arith.constant 0 : i32
    %2 = arith.cmpi ne, %1, %c0_i32_0 : i32
    scf.if %2 {
      %cst_10 = arith.constant 0.000000e+00 : f32
      %12 = vector.broadcast %cst_10 : f32 to vector<16x64xf32>
      %c0_11 = arith.constant 0 : index
      %c0_12 = arith.constant 0 : index
      %13 = vector.load %arg6[%c0_11, %c0_12] : memref<16x64xf32, #tpu.memory_space<vmem>>, vector<16x64xf32>
      tpu.vector_store %arg6[%c0_11, %c0_12], %12 {strides = array<i32>} : memref<16x64xf32, #tpu.memory_space<vmem>>, vector<16x64xf32>,
    } else {
    }
    %c0 = arith.constant 0 : index
    %c0_1 = arith.constant 0 : index
    %3 = vector.load %arg6[%c0, %c0_1] : memref<16x64xf32, #tpu.memory_space<vmem>>, vector<16x64xf32>
    %c0_2 = arith.constant 0 : index
    %c0_3 = arith.constant 0 : index
    %4 = vector.load %arg2[%c0_2, %c0_3] : memref<16x32xf32, #tpu.memory_space<vmem>>, vector<16x32xf32>
    %c0_4 = arith.constant 0 : index
    %c0_5 = arith.constant 0 : index
    %5 = vector.load %arg3[%c0_4, %c0_5] : memref<32x64xf32, #tpu.memory_space<vmem>>, vector<32x64xf32>
    %cst = arith.constant dense<0.000000e+00> : vector<16x64xf32>
    %6 = tpu.matmul %4, %5, %cst {dimension_numbers = #tpu.dot_dimension_numbers<[1], [0], [0], [1], [0, 0, 1, 1], [], []>} : vector<16x32xf32>, vector<32x64xf32>, vector<16x64xf32> -> vector<16x64xf32>
    %7 = arith.addf %3, %6 : vector<16x64xf32>
    %c0_6 = arith.constant 0 : index
    %c0_7 = arith.constant 0 : index
    %8 = vector.load %arg6[%c0_6, %c0_7] : memref<16x64xf32, #tpu.memory_space<vmem>>, vector<16x64xf32>
    tpu.vector_store %arg6[%c0_6, %c0_7], %7 {strides = array<i32>} : memref<16x64xf32, #tpu.memory_space<vmem>>, vector<16x64xf32>,
    %c0_i32_8 = arith.constant 0 : i32
    %9 = arith.cmpi eq, %arg1, %c0_i32_8 : i32
    %10 = arith.extui %9 : i1 to i32
    %c0_i32_9 = arith.constant 0 : i32
    %11 = arith.cmpi ne, %10, %c0_i32_9 : i32
    scf.if %11 {
      %c0_10 = arith.constant 0 : index
      %c0_11 = arith.constant 0 : index
      %12 = vector.load %arg6[%c0_10, %c0_11] : memref<16x64xf32, #tpu.memory_space<vmem>>, vector<16x64xf32>
      %c0_12 = arith.constant 0 : index
      %c0_13 = arith.constant 0 : index
      %13 = vector.load %arg4[%c0_12, %c0_13] : memref<1x64xf32, #tpu.memory_space<vmem>>, vector<1x64xf32>
      %14 = vector.broadcast %13 : vector<1x64xf32> to vector<16x64xf32>
      %15 = arith.addf %12, %14 : vector<16x64xf32>
      %cst_14 = arith.constant 5.000000e-01 : f32
      %16 = vector.broadcast %cst_14 : f32 to vector<16x64xf32>
      %17 = arith.mulf %16, %15 : vector<16x64xf32>
      %cst_15 = arith.constant 4.471500e-02 : f32
      %18 = vector.broadcast %cst_15 : f32 to vector<16x64xf32>
      %19 = arith.mulf %18, %15 : vector<16x64xf32>
      %20 = arith.mulf %19, %15 : vector<16x64xf32>
      %21 = arith.mulf %20, %15 : vector<16x64xf32>
      %22 = arith.addf %15, %21 : vector<16x64xf32>
      %cst_16 = arith.constant 0.797884583 : f32
      %23 = vector.broadcast %cst_16 : f32 to vector<16x64xf32>
      %24 = arith.mulf %23, %22 : vector<16x64xf32>
      %25 = math.tanh %24 : vector<16x64xf32>
      %cst_17 = arith.constant 1.000000e+00 : f32
      %26 = vector.broadcast %cst_17 : f32 to vector<16x64xf32>
      %27 = arith.addf %26, %25 : vector<16x64xf32>
      %28 = arith.mulf %17, %27 : vector<16x64xf32>
      %c0_18 = arith.constant 0 : index
      %c0_19 = arith.constant 0 : index
      %29 = vector.load %arg5[%c0_18, %c0_19] : memref<16x64xf32, #tpu.memory_space<vmem>>, vector<16x64xf32>
      tpu.vector_store %arg5[%c0_18, %c0_19], %28 {strides = array<i32>} : memref<16x64xf32, #tpu.memory_space<vmem>>, vector<16x64xf32>,
    } else {
    }
    return
  }
  func.func @transform_0(%arg0: i32, %arg1: i32) -> (i32, i32) {
    %c0_i32 = arith.constant 0 : i32
    return %arg0, %arg1 : i32, i32
  }
  func.func @transform_1(%arg0: i32, %arg1: i32) -> (i32, i32) {
    %c0_i32 = arith.constant 0 : i32
    %c0_i32_0 = arith.constant 0 : i32
    return %arg1, %c0_i32 : i32, i32
  }
  func.func @transform_2(%arg0: i32, %arg1: i32) -> (i32, i32) {
    %c0_i32 = arith.constant 0 : i32
    %c0_i32_0 = arith.constant 0 : i32
    %c0_i32_1 = arith.constant 0 : i32
    return %c0_i32, %c0_i32_0 : i32, i32
  }
  func.func @transform_3(%arg0: i32, %arg1: i32) -> (i32, i32) {
    %c0_i32 = arith.constant 0 : i32
    %c0_i32_0 = arith.constant 0 : i32
    return %arg0, %c0_i32 : i32, i32
  }
}

module attributes {stable_mosaic.version = 11 : i64} {
  func.func @_dense_res_ln_kernel(%arg0: i32, %arg1: i32, %arg2: memref<16x64xf32, #tpu.memory_space<vmem>>, %arg3: memref<16x32xf32, #tpu.memory_space<vmem>>, %arg4: memref<64x32xf32, #tpu.memory_space<vmem>>, %arg5: memref<1x32xf32, #tpu.memory_space<vmem>>, %arg6: memref<1x32xf32, #tpu.memory_space<vmem>>, %arg7: memref<1x32xf32, #tpu.memory_space<vmem>>, %arg8: memref<16x32xf32, #tpu.memory_space<vmem>>, %arg9: memref<16x32xf32, #tpu.memory_space<vmem>>) attributes {dimension_semantics = [#tpu.dimension_semantics<parallel>, #tpu.dimension_semantics<arbitrary>], iteration_bounds = array<i64: 1, 1>, scalar_prefetch = 0 : i64, scratch_operands = 1 : i64, tpu.core_type = #tpu.core_type<tc>, window_params = [{transform_indices = @transform_0, window_bounds = array<i64: 16, 64>}, {transform_indices = @transform_1, window_bounds = array<i64: 16, 32>}, {transform_indices = @transform_2, window_bounds = array<i64: 64, 32>}, {pipeline_mode = #tpu.pipeline_mode<synchronous>, transform_indices = @transform_3, window_bounds = array<i64: 1, 32>}, {pipeline_mode = #tpu.pipeline_mode<synchronous>, transform_indices = @transform_4, window_bounds = array<i64: 1, 32>}, {pipeline_mode = #tpu.pipeline_mode<synchronous>, transform_indices = @transform_5, window_bounds = array<i64: 1, 32>}, {transform_indices = @transform_6, window_bounds = array<i64: 16, 32>}]} {
    %c0_i32 = arith.constant 0 : i32
    %0 = arith.cmpi eq, %arg1, %c0_i32 : i32
    %1 = arith.extui %0 : i1 to i32
    %c0_i32_0 = arith.constant 0 : i32
    %2 = arith.cmpi ne, %1, %c0_i32_0 : i32
    scf.if %2 {
      %cst_10 = arith.constant 0.000000e+00 : f32
      %12 = vector.broadcast %cst_10 : f32 to vector<16x32xf32>
      %c0_11 = arith.constant 0 : index
      %c0_12 = arith.constant 0 : index
      %13 = vector.load %arg9[%c0_11, %c0_12] : memref<16x32xf32, #tpu.memory_space<vmem>>, vector<16x32xf32>
      tpu.vector_store %arg9[%c0_11, %c0_12], %12 {strides = array<i32>} : memref<16x32xf32, #tpu.memory_space<vmem>>, vector<16x32xf32>,
    } else {
    }
    %c0 = arith.constant 0 : index
    %c0_1 = arith.constant 0 : index
    %3 = vector.load %arg9[%c0, %c0_1] : memref<16x32xf32, #tpu.memory_space<vmem>>, vector<16x32xf32>
    %c0_2 = arith.constant 0 : index
    %c0_3 = arith.constant 0 : index
    %4 = vector.load %arg2[%c0_2, %c0_3] : memref<16x64xf32, #tpu.memory_space<vmem>>, vector<16x64xf32>
    %c0_4 = arith.constant 0 : index
    %c0_5 = arith.constant 0 : index
    %5 = vector.load %arg4[%c0_4, %c0_5] : memref<64x32xf32, #tpu.memory_space<vmem>>, vector<64x32xf32>
    %cst = arith.constant dense<0.000000e+00> : vector<16x32xf32>
    %6 = tpu.matmul %4, %5, %cst {dimension_numbers = #tpu.dot_dimension_numbers<[1], [0], [0], [1], [0, 0, 1, 1], [], []>} : vector<16x64xf32>, vector<64x32xf32>, vector<16x32xf32> -> vector<16x32xf32>
    %7 = arith.addf %3, %6 : vector<16x32xf32>
    %c0_6 = arith.constant 0 : index
    %c0_7 = arith.constant 0 : index
    %8 = vector.load %arg9[%c0_6, %c0_7] : memref<16x32xf32, #tpu.memory_space<vmem>>, vector<16x32xf32>
    tpu.vector_store %arg9[%c0_6, %c0_7], %7 {strides = array<i32>} : memref<16x32xf32, #tpu.memory_space<vmem>>, vector<16x32xf32>,
    %c0_i32_8 = arith.constant 0 : i32
    %9 = arith.cmpi eq, %arg1, %c0_i32_8 : i32
    %10 = arith.extui %9 : i1 to i32
    %c0_i32_9 = arith.constant 0 : i32
    %11 = arith.cmpi ne, %10, %c0_i32_9 : i32
    scf.if %11 {
      %c0_10 = arith.constant 0 : index
      %c0_11 = arith.constant 0 : index
      %12 = vector.load %arg9[%c0_10, %c0_11] : memref<16x32xf32, #tpu.memory_space<vmem>>, vector<16x32xf32>
      %c0_12 = arith.constant 0 : index
      %c0_13 = arith.constant 0 : index
      %13 = vector.load %arg5[%c0_12, %c0_13] : memref<1x32xf32, #tpu.memory_space<vmem>>, vector<1x32xf32>
      %14 = vector.broadcast %13 : vector<1x32xf32> to vector<16x32xf32>
      %15 = arith.addf %12, %14 : vector<16x32xf32>
      %c0_14 = arith.constant 0 : index
      %c0_15 = arith.constant 0 : index
      %16 = vector.load %arg3[%c0_14, %c0_15] : memref<16x32xf32, #tpu.memory_space<vmem>>, vector<16x32xf32>
      %17 = arith.addf %15, %16 : vector<16x32xf32>
      %cst_16 = arith.constant dense<0.000000e+00> : vector<16xf32>
      %18 = vector.multi_reduction <add>, %17, %cst_16 [1] : vector<16x32xf32> to vector<16xf32>
      %19 = vector.shape_cast %18 : vector<16xf32> to vector<16x1xf32>
      %cst_17 = arith.constant 3.200000e+01 : f32
      %20 = vector.broadcast %cst_17 : f32 to vector<16x1xf32>
      %21 = arith.divf %19, %20 : vector<16x1xf32>
      %22 = vector.broadcast %21 : vector<16x1xf32> to vector<16x32xf32>
      %23 = arith.subf %17, %22 : vector<16x32xf32>
      %24 = arith.mulf %23, %23 : vector<16x32xf32>
      %cst_18 = arith.constant dense<0.000000e+00> : vector<16xf32>
      %25 = vector.multi_reduction <add>, %24, %cst_18 [1] : vector<16x32xf32> to vector<16xf32>
      %26 = vector.shape_cast %25 : vector<16xf32> to vector<16x1xf32>
      %cst_19 = arith.constant 3.200000e+01 : f32
      %27 = vector.broadcast %cst_19 : f32 to vector<16x1xf32>
      %28 = arith.divf %26, %27 : vector<16x1xf32>
      %cst_20 = arith.constant 9.99999996E-13 : f32
      %29 = vector.broadcast %cst_20 : f32 to vector<16x1xf32>
      %30 = arith.addf %28, %29 : vector<16x1xf32>
      %31 = math.rsqrt %30 : vector<16x1xf32>
      %32 = vector.broadcast %31 : vector<16x1xf32> to vector<16x32xf32>
      %33 = arith.mulf %23, %32 : vector<16x32xf32>
      %c0_21 = arith.constant 0 : index
      %c0_22 = arith.constant 0 : index
      %34 = vector.load %arg6[%c0_21, %c0_22] : memref<1x32xf32, #tpu.memory_space<vmem>>, vector<1x32xf32>
      %35 = vector.broadcast %34 : vector<1x32xf32> to vector<16x32xf32>
      %36 = arith.mulf %33, %35 : vector<16x32xf32>
      %c0_23 = arith.constant 0 : index
      %c0_24 = arith.constant 0 : index
      %37 = vector.load %arg7[%c0_23, %c0_24] : memref<1x32xf32, #tpu.memory_space<vmem>>, vector<1x32xf32>
      %38 = vector.broadcast %37 : vector<1x32xf32> to vector<16x32xf32>
      %39 = arith.addf %36, %38 : vector<16x32xf32>
      %c0_25 = arith.constant 0 : index
      %c0_26 = arith.constant 0 : index
      %40 = vector.load %arg8[%c0_25, %c0_26] : memref<16x32xf32, #tpu.memory_space<vmem>>, vector<16x32xf32>
      tpu.vector_store %arg8[%c0_25, %c0_26], %39 {strides = array<i32>} : memref<16x32xf32, #tpu.memory_space<vmem>>, vector<16x32xf32>,
    } else {
    }
    return
  }
  func.func @transform_0(%arg0: i32, %arg1: i32) -> (i32, i32) {
    %c0_i32 = arith.constant 0 : i32
    return %arg0, %arg1 : i32, i32
  }
  func.func @transform_1(%arg0: i32, %arg1: i32) -> (i32, i32) {
    %c0_i32 = arith.constant 0 : i32
    %c0_i32_0 = arith.constant 0 : i32
    return %arg0, %c0_i32 : i32, i32
  }
  func.func @transform_2(%arg0: i32, %arg1: i32) -> (i32, i32) {
    %c0_i32 = arith.constant 0 : i32
    %c0_i32_0 = arith.constant 0 : i32
    return %arg1, %c0_i32 : i32, i32
  }
  func.func @transform_3(%arg0: i32, %arg1: i32) -> (i32, i32) {
    %c0_i32 = arith.constant 0 : i32
    %c0_i32_0 = arith.constant 0 : i32
    %c0_i32_1 = arith.constant 0 : i32
    return %c0_i32, %c0_i32_0 : i32, i32
  }
  func.func @transform_4(%arg0: i32, %arg1: i32) -> (i32, i32) {
    %c0_i32 = arith.constant 0 : i32
    %c0_i32_0 = arith.constant 0 : i32
    %c0_i32_1 = arith.constant 0 : i32
    return %c0_i32, %c0_i32_0 : i32, i32
  }
  func.func @transform_5(%arg0: i32, %arg1: i32) -> (i32, i32) {
    %c0_i32 = arith.constant 0 : i32
    %c0_i32_0 = arith.constant 0 : i32
    %c0_i32_1 = arith.constant 0 : i32
    return %c0_i32, %c0_i32_0 : i32, i32
  }
  func.func @transform_6(%arg0: i32, %arg1: i32) -> (i32, i32) {
    %c0_i32 = arith.constant 0 : i32
    %c0_i32_0 = arith.constant 0 : i32
    return %arg0, %c0_i32 : i32, i32
  }
}

module attributes {stable_mosaic.version = 11 : i64} {
  func.func @_dense_res_ln_kernel(%arg0: i32, %arg1: i32, %arg2: memref<16x64xf32, #tpu.memory_space<vmem>>, %arg3: memref<16x32xf32, #tpu.memory_space<vmem>>, %arg4: memref<64x32xf32, #tpu.memory_space<vmem>>, %arg5: memref<1x32xf32, #tpu.memory_space<vmem>>, %arg6: memref<1x32xf32, #tpu.memory_space<vmem>>, %arg7: memref<1x32xf32, #tpu.memory_space<vmem>>, %arg8: memref<16x32xf32, #tpu.memory_space<vmem>>, %arg9: memref<16x32xf32, #tpu.memory_space<vmem>>) attributes {dimension_semantics = [#tpu.dimension_semantics<parallel>, #tpu.dimension_semantics<arbitrary>], iteration_bounds = array<i64: 1, 1>, scalar_prefetch = 0 : i64, scratch_operands = 1 : i64, tpu.core_type = #tpu.core_type<tc>, window_params = [{transform_indices = @transform_0, window_bounds = array<i64: 16, 64>}, {transform_indices = @transform_1, window_bounds = array<i64: 16, 32>}, {transform_indices = @transform_2, window_bounds = array<i64: 64, 32>}, {pipeline_mode = #tpu.pipeline_mode<synchronous>, transform_indices = @transform_3, window_bounds = array<i64: 1, 32>}, {pipeline_mode = #tpu.pipeline_mode<synchronous>, transform_indices = @transform_4, window_bounds = array<i64: 1, 32>}, {pipeline_mode = #tpu.pipeline_mode<synchronous>, transform_indices = @transform_5, window_bounds = array<i64: 1, 32>}, {transform_indices = @transform_6, window_bounds = array<i64: 16, 32>}]} {
    %c0_i32 = arith.constant 0 : i32
    %0 = arith.cmpi eq, %arg1, %c0_i32 : i32
    %1 = arith.extui %0 : i1 to i32
    %c0_i32_0 = arith.constant 0 : i32
    %2 = arith.cmpi ne, %1, %c0_i32_0 : i32
    scf.if %2 {
      %cst_10 = arith.constant 0.000000e+00 : f32
      %12 = vector.broadcast %cst_10 : f32 to vector<16x32xf32>
      %c0_11 = arith.constant 0 : index
      %c0_12 = arith.constant 0 : index
      %13 = vector.load %arg9[%c0_11, %c0_12] : memref<16x32xf32, #tpu.memory_space<vmem>>, vector<16x32xf32>
      tpu.vector_store %arg9[%c0_11, %c0_12], %12 {strides = array<i32>} : memref<16x32xf32, #tpu.memory_space<vmem>>, vector<16x32xf32>,
    } else {
    }
    %c0 = arith.constant 0 : index
    %c0_1 = arith.constant 0 : index
    %3 = vector.load %arg9[%c0, %c0_1] : memref<16x32xf32, #tpu.memory_space<vmem>>, vector<16x32xf32>
    %c0_2 = arith.constant 0 : index
    %c0_3 = arith.constant 0 : index
    %4 = vector.load %arg2[%c0_2, %c0_3] : memref<16x64xf32, #tpu.memory_space<vmem>>, vector<16x64xf32>
    %c0_4 = arith.constant 0 : index
    %c0_5 = arith.constant 0 : index
    %5 = vector.load %arg4[%c0_4, %c0_5] : memref<64x32xf32, #tpu.memory_space<vmem>>, vector<64x32xf32>
    %cst = arith.constant dense<0.000000e+00> : vector<16x32xf32>
    %6 = tpu.matmul %4, %5, %cst {dimension_numbers = #tpu.dot_dimension_numbers<[1], [0], [0], [1], [0, 0, 1, 1], [], []>} : vector<16x64xf32>, vector<64x32xf32>, vector<16x32xf32> -> vector<16x32xf32>
    %7 = arith.addf %3, %6 : vector<16x32xf32>
    %c0_6 = arith.constant 0 : index
    %c0_7 = arith.constant 0 : index
    %8 = vector.load %arg9[%c0_6, %c0_7] : memref<16x32xf32, #tpu.memory_space<vmem>>, vector<16x32xf32>
    tpu.vector_store %arg9[%c0_6, %c0_7], %7 {strides = array<i32>} : memref<16x32xf32, #tpu.memory_space<vmem>>, vector<16x32xf32>,
    %c0_i32_8 = arith.constant 0 : i32
    %9 = arith.cmpi eq, %arg1, %c0_i32_8 : i32
    %10 = arith.extui %9 : i1 to i32
    %c0_i32_9 = arith.constant 0 : i32
    %11 = arith.cmpi ne, %10, %c0_i32_9 : i32
    scf.if %11 {
      %c0_10 = arith.constant 0 : index
      %c0_11 = arith.constant 0 : index
      %12 = vector.load %arg9[%c0_10, %c0_11] : memref<16x32xf32, #tpu.memory_space<vmem>>, vector<16x32xf32>
      %c0_12 = arith.constant 0 : index
      %c0_13 = arith.constant 0 : index
      %13 = vector.load %arg5[%c0_12, %c0_13] : memref<1x32xf32, #tpu.memory_space<vmem>>, vector<1x32xf32>
      %14 = vector.broadcast %13 : vector<1x32xf32> to vector<16x32xf32>
      %15 = arith.addf %12, %14 : vector<16x32xf32>
      %c0_14 = arith.constant 0 : index
      %c0_15 = arith.constant 0 : index
      %16 = vector.load %arg3[%c0_14, %c0_15] : memref<16x32xf32, #tpu.memory_space<vmem>>, vector<16x32xf32>
      %17 = arith.addf %15, %16 : vector<16x32xf32>
      %cst_16 = arith.constant dense<0.000000e+00> : vector<16xf32>
      %18 = vector.multi_reduction <add>, %17, %cst_16 [1] : vector<16x32xf32> to vector<16xf32>
      %19 = vector.shape_cast %18 : vector<16xf32> to vector<16x1xf32>
      %cst_17 = arith.constant 3.200000e+01 : f32
      %20 = vector.broadcast %cst_17 : f32 to vector<16x1xf32>
      %21 = arith.divf %19, %20 : vector<16x1xf32>
      %22 = vector.broadcast %21 : vector<16x1xf32> to vector<16x32xf32>
      %23 = arith.subf %17, %22 : vector<16x32xf32>
      %24 = arith.mulf %23, %23 : vector<16x32xf32>
      %cst_18 = arith.constant dense<0.000000e+00> : vector<16xf32>
      %25 = vector.multi_reduction <add>, %24, %cst_18 [1] : vector<16x32xf32> to vector<16xf32>
      %26 = vector.shape_cast %25 : vector<16xf32> to vector<16x1xf32>
      %cst_19 = arith.constant 3.200000e+01 : f32
      %27 = vector.broadcast %cst_19 : f32 to vector<16x1xf32>
      %28 = arith.divf %26, %27 : vector<16x1xf32>
      %cst_20 = arith.constant 9.99999996E-13 : f32
      %29 = vector.broadcast %cst_20 : f32 to vector<16x1xf32>
      %30 = arith.addf %28, %29 : vector<16x1xf32>
      %31 = math.rsqrt %30 : vector<16x1xf32>
      %32 = vector.broadcast %31 : vector<16x1xf32> to vector<16x32xf32>
      %33 = arith.mulf %23, %32 : vector<16x32xf32>
      %c0_21 = arith.constant 0 : index
      %c0_22 = arith.constant 0 : index
      %34 = vector.load %arg6[%c0_21, %c0_22] : memref<1x32xf32, #tpu.memory_space<vmem>>, vector<1x32xf32>
      %35 = vector.broadcast %34 : vector<1x32xf32> to vector<16x32xf32>
      %36 = arith.mulf %33, %35 : vector<16x32xf32>
      %c0_23 = arith.constant 0 : index
      %c0_24 = arith.constant 0 : index
      %37 = vector.load %arg7[%c0_23, %c0_24] : memref<1x32xf32, #tpu.memory_space<vmem>>, vector<1x32xf32>
      %38 = vector.broadcast %37 : vector<1x32xf32> to vector<16x32xf32>
      %39 = arith.addf %36, %38 : vector<16x32xf32>
      %c0_25 = arith.constant 0 : index
      %c0_26 = arith.constant 0 : index
      %40 = vector.load %arg8[%c0_25, %c0_26] : memref<16x32xf32, #tpu.memory_space<vmem>>, vector<16x32xf32>
      tpu.vector_store %arg8[%c0_25, %c0_26], %39 {strides = array<i32>} : memref<16x32xf32, #tpu.memory_space<vmem>>, vector<16x32xf32>,
    } else {
    }
    return
  }
  func.func @transform_0(%arg0: i32, %arg1: i32) -> (i32, i32) {
    %c0_i32 = arith.constant 0 : i32
    return %arg0, %arg1 : i32, i32
  }
  func.func @transform_1(%arg0: i32, %arg1: i32) -> (i32, i32) {
    %c0_i32 = arith.constant 0 : i32
    %c0_i32_0 = arith.constant 0 : i32
    return %arg0, %c0_i32 : i32, i32
  }
  func.func @transform_2(%arg0: i32, %arg1: i32) -> (i32, i32) {
    %c0_i32 = arith.constant 0 : i32
    %c0_i32_0 = arith.constant 0 : i32
    return %arg1, %c0_i32 : i32, i32
  }
  func.func @transform_3(%arg0: i32, %arg1: i32) -> (i32, i32) {
    %c0_i32 = arith.constant 0 : i32
    %c0_i32_0 = arith.constant 0 : i32
    %c0_i32_1 = arith.constant 0 : i32
    return %c0_i32, %c0_i32_0 : i32, i32
  }
  func.func @transform_4(%arg0: i32, %arg1: i32) -> (i32, i32) {
    %c0_i32 = arith.constant 0 : i32
    %c0_i32_0 = arith.constant 0 : i32
    %c0_i32_1 = arith.constant 0 : i32
    return %c0_i32, %c0_i32_0 : i32, i32
  }
  func.func @transform_5(%arg0: i32, %arg1: i32) -> (i32, i32) {
    %c0_i32 = arith.constant 0 : i32
    %c0_i32_0 = arith.constant 0 : i32
    %c0_i32_1 = arith.constant 0 : i32
    return %c0_i32, %c0_i32_0 : i32, i32
  }
  func.func @transform_6(%arg0: i32, %arg1: i32) -> (i32, i32) {
    %c0_i32 = arith.constant 0 : i32
    %c0_i32_0 = arith.constant 0 : i32
    return %arg0, %c0_i32 : i32, i32
  }
}

</mosaic_0001>

<bundles_post_ra>
// kernel: smith_encoder.10
= control target key start
LH: loop header
LB: loop body
LE: loop exit
PB: predicated region body
PF: predicated region fallthrough
CT: control target
= control target key end

     0   :  { %vm29_vm0 = vcmask 261120   ;;  %vm18_vm1 = vcmask 785408   ;;  %v157_v2 = vmov 0.0   ;;  %s213_s1 = inlined_call_operand.vmem [shape: f32[32,96], index: 1, kind: input, shape index: {}]   ;;  %s214_s0 = inlined_call_operand.vmem [shape: f32[16,32], index: 0, kind: input, shape index: {}]   ;;  %s215_s2 = inlined_call_operand.vmem [shape: f32[1,96], index: 2, kind: input, shape index: {}]   ;;  %s216_s3 = inlined_call_operand.vmem [shape: f32[16,96], index: 3, kind: output, shape index: {}]  }
   0x1   :  { %v28_v0 = vld [vmem:[%s213_s1 + $0x18] sm:$0xff]  ;;  %v27_v1 = vld [vmem:[%s213_s1 + $0x10] sm:$0xff]  ;;  %20 = vst.msk [vmem:[#allocation2 + $0x8] sm:$0xff] %vm18_vm1, %v157_v2  ;;  %19 = vst.msk [vmem:[#allocation2] sm:$0xff] %vm18_vm1, %v157_v2 }
   0x2   :  { %145 = vmatprep.subr.mxu0 %v28_v0  ;;  %v23_v3 = vld [vmem:[%s214_s0] sm:$0xff]  ;;  %v26_v4 = vld [vmem:[%s213_s1 + $0x8] sm:$0xff] }
   0x3   :  { %146 = vmatpush3.msra.mxu0 %v28_v0  ;;  %153 = vmatprep.mubr.msk.f32.mxu0 %vm29_vm0, %v23_v3  ;;  %v25_v5 = vld [vmem:[%s213_s1] sm:$0xff]  ;;  %v24_v6 = vld [vmem:[%s214_s0 + $0x8] sm:$0xff] }
   0x4   :  { %147 = vmatprep.subr.mxu0 %v27_v1  ;;  %v138_v13 = vld [vmem:[%s215_s2] ss:$0 sm:$0xff] }
   0x5   :  { %148 = vmatpush3.msra.mxu0 %v27_v1 }
   0x6   :  { %149 = vmatprep.subr.mxu0 %v26_v4 }
   0x7   :  { %150 = vmatpush3.msra.mxu0 %v26_v4 }
   0x8   :  { %151 = vmatprep.subr.mxu0 %v25_v5  ;;  %v22_v7 = vld [vmem:[#allocation2 + $0x8] sm:$0xff]  ;;  %v21_v9 = vld [vmem:[#allocation2] sm:$0xff] }
   0x9   :  { %152 = vmatpush3.msra.mxu0 %v25_v5 }
   0xa   :  { %154 = vmatmul.mubr.msk.f32.vlgmr.msra.gmra.mxu0 %vm29_vm0, %v24_v6 }
  0xca   :  { %v155_v8 = vpop.f32.mrf.mxu0 }
  0xcb   :  { %v112_v10 = vadd.f32 %v155_v8, %v22_v7 }
  0xcc   :  { %v102_v11 = vpop.f32.mrf.mxu0 }
  0xcd   :  { %115 = vst.msk [vmem:[#allocation2 + $0x8] sm:$0xff] %vm18_vm1, %v112_v10  ;;  %v111_v12 = vadd.f32 %v102_v11, %v21_v9 }
  0xcf   :  { %114 = vst.msk [vmem:[#allocation2] sm:$0xff] %vm18_vm1, %v111_v12 }
  0xd4   :  { %v120_v14 = vld [vmem:[#allocation2 + $0x8] sm:$0xff] }
  0xd5   :  { %v129_v15 = vadd.f32 %v138_v13, %v120_v14 }
  0xd6   :  { %v119_v16 = vld [vmem:[#allocation2] sm:$0xff] }
  0xd7   :  { %131 = vst.msk [vmem:[%s216_s3 + $0x8] sm:$0xff] %vm18_vm1, %v129_v15  ;;  %v128_v17 = vadd.f32 %v138_v13, %v119_v16 }
  0xd9   :  { %130 = vst.msk [vmem:[%s216_s3] sm:$0xff] %vm18_vm1, %v128_v17 }

// kernel: smith_encoder.11
= control target key start
LH: loop header
LB: loop body
LE: loop exit
PB: predicated region body
PF: predicated region fallthrough
CT: control target
= control target key end

     0   :  { %s580_s15 = smov 0   ;;  %s618_s0 = inlined_call_operand.vmem [shape: f32[4,8,16], index: 0, kind: input, shape index: {}]   ;;  %s619_s1 = inlined_call_operand.vmem [shape: f32[4,8,16], index: 1, kind: input, shape index: {}]   ;;  %s620_s2 = inlined_call_operand.vmem [shape: f32[4,8,16], index: 2, kind: input, shape index: {}]   ;;  %s621_s3 = inlined_call_operand.vmem [shape: f32[4,1,8], index: 3, kind: input, shape index: {}]   ;;  %s622_s4 = inlined_call_operand.vmem [shape: f32[4,8,16], index: 4, kind: output, shape index: {}]  }
   0x1 LB: > { %s502_s16 = sadd.s32 4294967295, %s551_s15   ;;  %p506_p0 = scmp.ge.s32.totalorder %s551_s15, 1  ;;  %s551_s15 = sphi %s580_s15, %s14_s15  }
   0x2   : > { %p187_p1 = scmp.lt.s32.totalorder %s551_s15, 5 }
   0x4   : > { %p188_p2 = pnand %p506_p0, %p187_p1 }
   0x5   : > { %p222_p3 = scmp.lt.s32.totalorder (!%p188_p2), %s502_s16, 3 }
   0x6   : > { %191 = sbr.rel (%p188_p2) target bundleno = 722 (0x2d2), region = 36 }
   0xb   : > { %v553_v0 = vmov 0.0   ;;  %vm554_vm0 = vmmov 0   ;;  %s624_s16 = smov (!%p222_p3, %s502_s16), 3  ;;  %vm243_vm1 = vcmask 130048   ;;  %vm329_vm2 = vcmask 64512  }
   0xc   : > { %521 = vmatprep.subr.mxu0 %v553_v0  ;;  %523 = vmatprep.mubr.msk.f32.mxu0 %vm554_vm0, %v553_v0  ;;  %s588_s17 = sshll.u32 %s624_s16, 3  ;;  %s236_s26 = scalar_lea.vmem %s621_s3, %s624_s16 }
   0xd   : > { %526 = vmatprep.subr.mxu1 %v553_v0  ;;  %528 = vmatprep.mubr.msk.f32.mxu1 %vm554_vm0, %v553_v0  ;;  %s229_s20 = scalar_lea.vmem %s619_s1, %s588_s17  ;;  %s225_s23 = scalar_lea.vmem %s618_s0, %s588_s17  ;;  %v513_v4 = vld [vmem:[%s236_s26] ss:$0 sm:$0xff] }
   0xe   : > { %v242_v1 = vld [vmem:[%s229_s20] sm:$0xff]  ;;  %s233_s29 = scalar_lea.vmem %s620_s2, %s588_s17  ;;  %s240_s6 = scalar_lea.vmem %s622_s4, %s588_s17 }
   0xf   : > { %522 = vmatpush3.xpose.msk.msra.mxu0 %vm243_vm1, %v242_v1  ;;  %v241_v2 = vld [vmem:[%s225_s23] sm:$0xff] }
  0x10   : > { %v341_v14 = vld [vmem:[%s233_s29] sm:$0xff] }
  0x11   : > { %527 = vmatpush3.msra.mxu1 %v341_v14 }
  0x12   : > { %524 = vmatmul.mubr.msk.f32.vlgmr.msra.gmra.mxu0 %vm243_vm1, %v241_v2 }
  0xd2   : > { %v316_v3 = vpop.f32.mrf.mxu0 }
  0xd3   : > { %v320_v5 = vmul.f32 0.25, %v316_v3 }
  0xd4   : > { %v525_v6 = vpop.f32.mrf.mxu0 }
  0xd5   : > { %v328_v7 = vadd.f32 %v513_v4, %v320_v5 }
  0xd7   : > { %v330_v8 = vsel %vm329_vm2, %v328_v7, -inf }
  0xd8   : > { %331 = vmax.xlane.f32.xlu0 %v330_v8 }
 0x161   : > { %v332_v9 = vpop.xlane.xlu0 %331 }
 0x162   : > { %v333_v10 = vsub.f32 %v328_v7, %v332_v9 }
 0x164   : > { %v334_v11 = vmul.f32 1.442695, %v333_v10 }
 0x166   : > { %541 = vpow2.f32 %v334_v11 }
 0x173   : > { %v542_v12 = vpop.eup %541 }
 0x174   : > { %v336_v13 = vsel %vm329_vm2, %v542_v12, 0.0 }
 0x175   : > { %337 = vadd.xlane.f32.xlu0 %v336_v13 }
 0x1fe   : > { %v338_v15 = vpop.xlane.xlu0 %337 }
 0x1ff   : > { %543 = vrcp.f32 %v338_v15 }
 0x20c   : > { %v544_v16 = vpop.eup %543 }
 0x20d   : > { %v340_v17 = vmul.f32 %v544_v16, %v542_v12 }
 0x20f   : > { %529 = vmatmul.mubr.msk.f32.vlgmr.msra.gmra.mxu1 %vm329_vm2, %v340_v17 }
 0x2cf   : > { %v411_v18 = vpop.f32.mrf.mxu1 }
 0x2d0   : > { %415 = vst.msk [vmem:[%s240_s6] sm:$0xff] %vm243_vm1, %v411_v18 }
 0x2d1   : > { %v530_v19 = vpop.f32.mrf.mxu1 }
 0x2d2 PF: > { %s14_s15 = sadd.s32 1, %s551_s15  }
 0x2d3   : > { %p11_p4 = scmp.ge.s32.totalorder %s14_s15, 6  }
 0x2d5   :  { %13 = sbr.rel (!%p11_p4) target bundleno = 1 (0x1), region = 75 }

// kernel: smith_encoder.12
= control target key start
LH: loop header
LB: loop body
LE: loop exit
PB: predicated region body
PF: predicated region fallthrough
CT: control target
= control target key end

     0   :  { %vm27_vm0 = vcmask 261120   ;;  %v220_v2 = vmov 0.0   ;;  %s307_s2 = inlined_call_operand.vmem [shape: f32[32,32], index: 2, kind: input, shape index: {}]   ;;  %s308_s0 = inlined_call_operand.vmem [shape: f32[16,32], index: 0, kind: input, shape index: {}]   ;;  %s309_s3 = inlined_call_operand.vmem [shape: f32[1,32], index: 3, kind: input, shape index: {}]   ;;  %s310_s1 = inlined_call_operand.vmem [shape: f32[16,32], index: 1, kind: input, shape index: {}]   ;;  %s311_s4 = inlined_call_operand.vmem [shape: f32[1,32], index: 4, kind: input, shape index: {}]   ;;  %s312_s5 = inlined_call_operand.vmem [shape: f32[1,32], index: 5, kind: input, shape index: {}]   ;;  %s313_s6 = inlined_call_operand.vmem [shape: f32[16,32], index: 6, kind: output, shape index: {}]  }
   0x1   :  { %v37_v0 = vld [vmem:[%s307_s2 + $0x18] sm:$0xff]  ;;  %v36_v1 = vld [vmem:[%s307_s2 + $0x10] sm:$0xff]  ;;  %29 = vst.msk [vmem:[#allocation2 + $0x8] sm:$0xff] %vm27_vm0, %v220_v2  ;;  %28 = vst.msk [vmem:[#allocation2] sm:$0xff] %vm27_vm0, %v220_v2 }
   0x2   :  { %204 = vmatprep.subr.mxu0 %v37_v0  ;;  %v32_v3 = vld [vmem:[%s308_s0] sm:$0xff]  ;;  %v35_v4 = vld [vmem:[%s307_s2 + $0x8] sm:$0xff] }
   0x3   :  { %205 = vmatpush3.msra.mxu0 %v37_v0  ;;  %212 = vmatprep.mubr.msk.f32.mxu0 %vm27_vm0, %v32_v3  ;;  %v34_v5 = vld [vmem:[%s307_s2] sm:$0xff]  ;;  %v33_v6 = vld [vmem:[%s308_s0 + $0x8] sm:$0xff] }
   0x4   :  { %206 = vmatprep.subr.mxu0 %v36_v1  ;;  %v195_v13 = vld [vmem:[%s309_s3] ss:$0 sm:$0xff]  ;;  %v139_v19 = vld [vmem:[%s310_s1 + $0x8] sm:$0xff] }
   0x5   :  { %207 = vmatpush3.msra.mxu0 %v36_v1  ;;  %v138_v16 = vld [vmem:[%s310_s1] sm:$0xff] }
   0x6   :  { %208 = vmatprep.subr.mxu0 %v35_v4  ;;  %v196_v41 = vld [vmem:[%s311_s4] ss:$0 sm:$0xff] }
   0x7   :  { %209 = vmatpush3.msra.mxu0 %v35_v4  ;;  %v197_v43 = vld [vmem:[%s312_s5] ss:$0 sm:$0xff] }
   0x8   :  { %210 = vmatprep.subr.mxu0 %v34_v5  ;;  %v31_v7 = vld [vmem:[#allocation2 + $0x8] sm:$0xff]  ;;  %v30_v9 = vld [vmem:[#allocation2] sm:$0xff] }
   0x9   :  { %211 = vmatpush3.msra.mxu0 %v34_v5 }
   0xa   :  { %213 = vmatmul.mubr.msk.f32.vlgmr.msra.gmra.mxu0 %vm27_vm0, %v33_v6 }
  0xca   :  { %v214_v8 = vpop.f32.mrf.mxu0 }
  0xcb   :  { %v121_v10 = vadd.f32 %v214_v8, %v31_v7 }
  0xcc   :  { %v111_v11 = vpop.f32.mrf.mxu0 }
  0xcd   :  { %123 = vst.msk [vmem:[#allocation2 + $0x8] sm:$0xff] %vm27_vm0, %v121_v10  ;;  %v120_v12 = vadd.f32 %v111_v11, %v30_v9 }
  0xcf   :  { %122 = vst.msk [vmem:[#allocation2] sm:$0xff] %vm27_vm0, %v120_v12 }
  0xd4   :  { %v128_v14 = vld [vmem:[#allocation2 + $0x8] sm:$0xff] }
  0xd5   :  { %v137_v18 = vadd.f32 %v195_v13, %v128_v14 }
  0xd6   :  { %v127_v15 = vld [vmem:[#allocation2] sm:$0xff] }
  0xd7   :  { %v136_v17 = vadd.f32 %v195_v13, %v127_v15  ;;  %v141_v22 = vadd.f32 %v139_v19, %v137_v18 }
  0xd9   :  { %v140_v20 = vadd.f32 %v138_v16, %v136_v17  ;;  %v145_v23 = vsel %vm27_vm0, %v141_v22, 0.0 }
  0xdb   :  { %v142_v21 = vsel %vm27_vm0, %v140_v20, 0.0 }
  0xdc   :  { %143 = vadd.xlane.f32.xlu0 %v142_v21 }
  0xe0   :  { %146 = vadd.xlane.f32.xlu0 %v145_v23 }
 0x165   :  { %v144_v24 = vpop.xlane.xlu0 %143 }
 0x166   :  { %v149_v25 = vmul.f32 0.03125, %v144_v24 }
 0x168   :  { %v151_v26 = vsub.f32 %v140_v20, %v149_v25 }
 0x169   :  { %v147_v27 = vpop.xlane.xlu0 %146 }
 0x16a   :  { %v150_v28 = vmul.f32 0.03125, %v147_v27  ;;  %v153_v29 = vmul.f32 %v151_v26, %v151_v26 }
 0x16c   :  { %v152_v30 = vsub.f32 %v141_v22, %v150_v28  ;;  %v155_v31 = vsel %vm27_vm0, %v153_v29, 0.0 }
 0x16d   :  { %156 = vadd.xlane.f32.xlu1 %v155_v31 }
 0x16e   :  { %v154_v32 = vmul.f32 %v152_v30, %v152_v30 }
 0x170   :  { %v158_v33 = vsel %vm27_vm0, %v154_v32, 0.0 }
 0x171   :  { %159 = vadd.xlane.f32.xlu1 %v158_v33 }
 0x1f6   :  { %v157_v34 = vpop.xlane.xlu1 %156 }
 0x1f7   :  { %v161_v35 = vmul.f32 0.03125, %v157_v34 }
 0x1f9   :  { %v163_v36 = vadd.f32 1e-12, %v161_v35 }
 0x1fa   :  { %v160_v37 = vpop.xlane.xlu1 %159 }
 0x1fb   :  { %216 = vrsqrt.f32 %v163_v36  ;;  %v162_v38 = vmul.f32 0.03125, %v160_v37 }
 0x1fd   :  { %v164_v39 = vadd.f32 1e-12, %v162_v38 }
 0x1ff   :  { %218 = vrsqrt.f32 %v164_v39 }
 0x208   :  { %v217_v40 = vpop.eup %216 }
 0x209   :  { %v167_v42 = vmul.f32 %v217_v40, %v151_v26 }
 0x20b   :  { %v176_v44 = vmul.f32 %v196_v41, %v167_v42 }
 0x20c   :  { %v219_v45 = vpop.eup %218 }
 0x20d   :  { %v185_v46 = vadd.f32 %v197_v43, %v176_v44  ;;  %v168_v47 = vmul.f32 %v219_v45, %v152_v30 }
 0x20f   :  { %187 = vst.msk [vmem:[%s313_s6] sm:$0xff] %vm27_vm0, %v185_v46  ;;  %v177_v48 = vmul.f32 %v196_v41, %v168_v47 }
 0x211   :  { %v186_v49 = vadd.f32 %v197_v43, %v177_v48 }
 0x213   :  { %188 = vst.msk [vmem:[%s313_s6 + $0x8] sm:$0xff] %vm27_vm0, %v186_v49 }

// kernel: smith_encoder.13
= control target key start
LH: loop header
LB: loop body
LE: loop exit
PB: predicated region body
PF: predicated region fallthrough
CT: control target
= control target key end

     0   :  { %vm29_vm0 = vcmask 261120   ;;  %vm18_vm1 = vcmask 523264   ;;  %v179_v2 = vmov 0.0   ;;  %s235_s1 = inlined_call_operand.vmem [shape: f32[32,64], index: 1, kind: input, shape index: {}]   ;;  %s236_s0 = inlined_call_operand.vmem [shape: f32[16,32], index: 0, kind: input, shape index: {}]   ;;  %s237_s2 = inlined_call_operand.vmem [shape: f32[1,64], index: 2, kind: input, shape index: {}]   ;;  %s238_s3 = inlined_call_operand.vmem [shape: f32[16,64], index: 3, kind: output, shape index: {}]  }
   0x1   :  { %v28_v0 = vld [vmem:[%s235_s1 + $0x18] sm:$0xff]  ;;  %v27_v1 = vld [vmem:[%s235_s1 + $0x10] sm:$0xff]  ;;  %20 = vst.msk [vmem:[#allocation2 + $0x8] sm:$0xff] %vm18_vm1, %v179_v2  ;;  %19 = vst.msk [vmem:[#allocation2] sm:$0xff] %vm18_vm1, %v179_v2 }
   0x2   :  { %163 = vmatprep.subr.mxu0 %v28_v0  ;;  %v23_v3 = vld [vmem:[%s236_s0] sm:$0xff]  ;;  %v26_v4 = vld [vmem:[%s235_s1 + $0x8] sm:$0xff] }
   0x3   :  { %164 = vmatpush3.msra.mxu0 %v28_v0  ;;  %171 = vmatprep.mubr.msk.f32.mxu0 %vm29_vm0, %v23_v3  ;;  %v25_v5 = vld [vmem:[%s235_s1] sm:$0xff]  ;;  %v24_v6 = vld [vmem:[%s236_s0 + $0x8] sm:$0xff] }
   0x4   :  { %165 = vmatprep.subr.mxu0 %v27_v1  ;;  %v156_v13 = vld [vmem:[%s237_s2] ss:$0 sm:$0xff] }
   0x5   :  { %166 = vmatpush3.msra.mxu0 %v27_v1 }
   0x6   :  { %167 = vmatprep.subr.mxu0 %v26_v4 }
   0x7   :  { %168 = vmatpush3.msra.mxu0 %v26_v4 }
   0x8   :  { %169 = vmatprep.subr.mxu0 %v25_v5  ;;  %v22_v7 = vld [vmem:[#allocation2 + $0x8] sm:$0xff]  ;;  %v21_v9 = vld [vmem:[#allocation2] sm:$0xff] }
   0x9   :  { %170 = vmatpush3.msra.mxu0 %v25_v5 }
   0xa   :  { %172 = vmatmul.mubr.msk.f32.vlgmr.msra.gmra.mxu0 %vm29_vm0, %v24_v6 }
  0xca   :  { %v173_v8 = vpop.f32.mrf.mxu0 }
  0xcb   :  { %v112_v10 = vadd.f32 %v173_v8, %v22_v7 }
  0xcc   :  { %v102_v11 = vpop.f32.mrf.mxu0 }
  0xcd   :  { %115 = vst.msk [vmem:[#allocation2 + $0x8] sm:$0xff] %vm18_vm1, %v112_v10  ;;  %v111_v12 = vadd.f32 %v102_v11, %v21_v9 }
  0xcf   :  { %114 = vst.msk [vmem:[#allocation2] sm:$0xff] %vm18_vm1, %v111_v12 }
  0xd4   :  { %v120_v14 = vld [vmem:[#allocation2 + $0x8] sm:$0xff] }
  0xd5   :  { %v129_v15 = vadd.f32 %v156_v13, %v120_v14 }
  0xd6   :  { %v119_v16 = vld [vmem:[#allocation2] sm:$0xff] }
  0xd7   :  { %v133_v17 = vmul.f32 0.044715, %v129_v15  ;;  %v128_v18 = vadd.f32 %v156_v13, %v119_v16  ;;  %v131_v29 = vmul.f32 0.5, %v129_v15 }
  0xd9   :  { %v135_v19 = vmul.f32 %v133_v17, %v129_v15  ;;  %v132_v20 = vmul.f32 0.044715, %v128_v18  ;;  %v130_v33 = vmul.f32 0.5, %v128_v18 }
  0xdb   :  { %v137_v21 = vmul.f32 %v135_v19, %v129_v15  ;;  %v134_v22 = vmul.f32 %v132_v20, %v128_v18 }
  0xdd   :  { %v139_v23 = vadd.f32 %v137_v21, %v129_v15  ;;  %v136_v24 = vmul.f32 %v134_v22, %v128_v18 }
  0xdf   :  { %v141_v25 = vmul.f32 0.7978846, %v139_v23  ;;  %v138_v26 = vadd.f32 %v136_v24, %v128_v18 }
  0xe1   :  { %175 = vtanh.f32 %v141_v25  ;;  %v140_v27 = vmul.f32 0.7978846, %v138_v26 }
  0xe3   :  { %177 = vtanh.f32 %v140_v27 }
  0xee   :  { %v176_v28 = vpop.eup %175 }
  0xef   :  { %v145_v30 = vadd.f32 1.0, %v176_v28 }
  0xf0   :  { %v178_v31 = vpop.eup %177 }
  0xf1   :  { %v147_v32 = vmul.f32 %v145_v30, %v131_v29  ;;  %v144_v34 = vadd.f32 1.0, %v178_v31 }
  0xf3   :  { %149 = vst.msk [vmem:[%s238_s3 + $0x8] sm:$0xff] %vm18_vm1, %v147_v32  ;;  %v146_v35 = vmul.f32 %v144_v34, %v130_v33 }
  0xf5   :  { %148 = vst.msk [vmem:[%s238_s3] sm:$0xff] %vm18_vm1, %v146_v35 }

// kernel: smith_encoder.14
= control target key start
LH: loop header
LB: loop body
LE: loop exit
PB: predicated region body
PF: predicated region fallthrough
CT: control target
= control target key end

     0   :  { %vm27_vm0 = vcmask 261120   ;;  %vm42_vm1 = vcmask 523264   ;;  %v237_v2 = vmov 0.0   ;;  %s336_s2 = inlined_call_operand.vmem [shape: f32[64,32], index: 2, kind: input, shape index: {}]   ;;  %s337_s0 = inlined_call_operand.vmem [shape: f32[16,64], index: 0, kind: input, shape index: {}]   ;;  %s338_s3 = inlined_call_operand.vmem [shape: f32[1,32], index: 3, kind: input, shape index: {}]   ;;  %s339_s1 = inlined_call_operand.vmem [shape: f32[16,32], index: 1, kind: input, shape index: {}]   ;;  %s340_s4 = inlined_call_operand.vmem [shape: f32[1,32], index: 4, kind: input, shape index: {}]   ;;  %s341_s5 = inlined_call_operand.vmem [shape: f32[1,32], index: 5, kind: input, shape index: {}]   ;;  %s342_s6 = inlined_call_operand.vmem [shape: f32[16,32], index: 6, kind: output, shape index: {}]  }
   0x1   :  { %v41_v0 = vld [vmem:[%s336_s2 + $0x38] sm:$0xff]  ;;  %v40_v1 = vld [vmem:[%s336_s2 + $0x30] sm:$0xff]  ;;  %29 = vst.msk [vmem:[#allocation2 + $0x8] sm:$0xff] %vm27_vm0, %v237_v2  ;;  %28 = vst.msk [vmem:[#allocation2] sm:$0xff] %vm27_vm0, %v237_v2 }
   0x2   :  { %213 = vmatprep.subr.mxu0 %v41_v0  ;;  %v39_v3 = vld [vmem:[%s336_s2 + $0x28] sm:$0xff]  ;;  %v32_v4 = vld [vmem:[%s337_s0] sm:$0xff]  ;;  %v37_v6 = vld [vmem:[%s336_s2 + $0x18] sm:$0xff] }
   0x3   :  { %214 = vmatpush3.msra.mxu0 %v41_v0  ;;  %229 = vmatprep.mubr.msk.f32.mxu0 %vm42_vm1, %v32_v4  ;;  %v38_v5 = vld [vmem:[%s336_s2 + $0x20] sm:$0xff]  ;;  %v36_v7 = vld [vmem:[%s336_s2 + $0x10] sm:$0xff]  ;;  %v35_v8 = vld [vmem:[%s336_s2 + $0x8] sm:$0xff] }
   0x4   :  { %215 = vmatprep.subr.mxu0 %v40_v1  ;;  %v34_v9 = vld [vmem:[%s336_s2] sm:$0xff]  ;;  %v33_v10 = vld [vmem:[%s337_s0 + $0x8] sm:$0xff] }
   0x5   :  { %216 = vmatpush3.msra.mxu0 %v40_v1  ;;  %v200_v17 = vld [vmem:[%s338_s3] ss:$0 sm:$0xff]  ;;  %v144_v23 = vld [vmem:[%s339_s1 + $0x8] sm:$0xff] }
   0x6   :  { %217 = vmatprep.subr.mxu0 %v39_v3  ;;  %v143_v20 = vld [vmem:[%s339_s1] sm:$0xff] }
   0x7   :  { %218 = vmatpush3.msra.mxu0 %v39_v3  ;;  %v201_v45 = vld [vmem:[%s340_s4] ss:$0 sm:$0xff] }
   0x8   :  { %219 = vmatprep.subr.mxu0 %v38_v5  ;;  %v31_v11 = vld [vmem:[#allocation2 + $0x8] sm:$0xff]  ;;  %v30_v13 = vld [vmem:[#allocation2] sm:$0xff] }
   0x9   :  { %220 = vmatpush3.msra.mxu0 %v38_v5  ;;  %v202_v47 = vld [vmem:[%s341_s5] ss:$0 sm:$0xff] }
   0xa   :  { %221 = vmatprep.subr.mxu0 %v37_v6 }
   0xb   :  { %222 = vmatpush3.msra.mxu0 %v37_v6 }
   0xc   :  { %223 = vmatprep.subr.mxu0 %v36_v7 }
   0xd   :  { %224 = vmatpush3.msra.mxu0 %v36_v7 }
   0xe   :  { %225 = vmatprep.subr.mxu0 %v35_v8 }
   0xf   :  { %226 = vmatpush3.msra.mxu0 %v35_v8 }
  0x10   :  { %227 = vmatprep.subr.mxu0 %v34_v9 }
  0x11   :  { %228 = vmatpush3.msra.mxu0 %v34_v9 }
  0x12   :  { %230 = vmatmul.mubr.msk.f32.vlgmr.msra.gmra.mxu0 %vm42_vm1, %v33_v10 }
  0xd2   :  { %v231_v12 = vpop.f32.mrf.mxu0 }
  0xd3   :  { %v125_v14 = vadd.f32 %v231_v12, %v31_v11 }
  0xd4   :  { %v115_v15 = vpop.f32.mrf.mxu0 }
  0xd5   :  { %128 = vst.msk [vmem:[#allocation2 + $0x8] sm:$0xff] %vm27_vm0, %v125_v14  ;;  %v124_v16 = vadd.f32 %v115_v15, %v30_v13 }
  0xd7   :  { %127 = vst.msk [vmem:[#allocation2] sm:$0xff] %vm27_vm0, %v124_v16 }
  0xdc   :  { %v133_v18 = vld [vmem:[#allocation2 + $0x8] sm:$0xff] }
  0xdd   :  { %v142_v22 = vadd.f32 %v200_v17, %v133_v18 }
  0xde   :  { %v132_v19 = vld [vmem:[#allocation2] sm:$0xff] }
  0xdf   :  { %v141_v21 = vadd.f32 %v200_v17, %v132_v19  ;;  %v146_v26 = vadd.f32 %v144_v23, %v142_v22 }
  0xe1   :  { %v145_v24 = vadd.f32 %v143_v20, %v141_v21  ;;  %v150_v27 = vsel %vm27_vm0, %v146_v26, 0.0 }
  0xe3   :  { %v147_v25 = vsel %vm27_vm0, %v145_v24, 0.0 }
  0xe4   :  { %148 = vadd.xlane.f32.xlu0 %v147_v25 }
  0xe8   :  { %151 = vadd.xlane.f32.xlu0 %v150_v27 }
 0x16d   :  { %v149_v28 = vpop.xlane.xlu0 %148 }
 0x16e   :  { %v154_v29 = vmul.f32 0.03125, %v149_v28 }
 0x170   :  { %v156_v30 = vsub.f32 %v145_v24, %v154_v29 }
 0x171   :  { %v152_v31 = vpop.xlane.xlu0 %151 }
 0x172   :  { %v155_v32 = vmul.f32 0.03125, %v152_v31  ;;  %v158_v33 = vmul.f32 %v156_v30, %v156_v30 }
 0x174   :  { %v157_v34 = vsub.f32 %v146_v26, %v155_v32  ;;  %v160_v35 = vsel %vm27_vm0, %v158_v33, 0.0 }
 0x175   :  { %161 = vadd.xlane.f32.xlu1 %v160_v35 }
 0x176   :  { %v159_v36 = vmul.f32 %v157_v34, %v157_v34 }
 0x178   :  { %v163_v37 = vsel %vm27_vm0, %v159_v36, 0.0 }
 0x179   :  { %164 = vadd.xlane.f32.xlu1 %v163_v37 }
 0x1fe   :  { %v162_v38 = vpop.xlane.xlu1 %161 }
 0x1ff   :  { %v166_v39 = vmul.f32 0.03125, %v162_v38 }
 0x201   :  { %v168_v40 = vadd.f32 1e-12, %v166_v39 }
 0x202   :  { %v165_v41 = vpop.xlane.xlu1 %164 }
 0x203   :  { %233 = vrsqrt.f32 %v168_v40  ;;  %v167_v42 = vmul.f32 0.03125, %v165_v41 }
 0x205   :  { %v169_v43 = vadd.f32 1e-12, %v167_v42 }
 0x207   :  { %235 = vrsqrt.f32 %v169_v43 }
 0x210   :  { %v234_v44 = vpop.eup %233 }
 0x211   :  { %v172_v46 = vmul.f32 %v234_v44, %v156_v30 }
 0x213   :  { %v181_v48 = vmul.f32 %v201_v45, %v172_v46 }
 0x214   :  { %v236_v49 = vpop.eup %235 }
 0x215   :  { %v190_v50 = vadd.f32 %v202_v47, %v181_v48  ;;  %v173_v51 = vmul.f32 %v236_v49, %v157_v34 }
 0x217   :  { %192 = vst.msk [vmem:[%s342_s6] sm:$0xff] %vm27_vm0, %v190_v50  ;;  %v182_v52 = vmul.f32 %v201_v45, %v173_v51 }
 0x219   :  { %v191_v53 = vadd.f32 %v202_v47, %v182_v52 }
 0x21b   :  { %193 = vst.msk [vmem:[%s342_s6 + $0x8] sm:$0xff] %vm27_vm0, %v191_v53 }

// kernel: smith_encoder.19
= control target key start
LH: loop header
LB: loop body
LE: loop exit
PB: predicated region body
PF: predicated region fallthrough
CT: control target
= control target key end

     0   :  { %vm43_vm0 = vcmask 523264   ;;  %vm28_vm1 = vcmask 261120   ;;  %v275_v2 = vmov 0.0   ;;  %s374_s0 = inlined_call_operand.vmem [shape: f32[16,64], index: 0, kind: input, shape index: {}]   ;;  %s375_s1 = inlined_call_operand.vmem [shape: f32[16,32], index: 1, kind: input, shape index: {}]   ;;  %s376_s2 = inlined_call_operand.vmem [shape: f32[64,32], index: 2, kind: input, shape index: {}]   ;;  %s377_s3 = inlined_call_operand.vmem [shape: f32[1,32], index: 3, kind: input, shape index: {}]   ;;  %s378_s4 = inlined_call_operand.vmem [shape: f32[1,32], index: 4, kind: input, shape index: {}]   ;;  %s379_s5 = inlined_call_operand.vmem [shape: f32[1,32], index: 5, kind: input, shape index: {}]   ;;  %s380_s6 = inlined_call_operand.hbm [shape: f32[16,32], index: 6, kind: output, shape index: {}]  }
   0x1   :  { %v42_v0 = vld [vmem:[%s376_s2 + $0x38] sm:$0xff]  ;;  %v41_v1 = vld [vmem:[%s376_s2 + $0x30] sm:$0xff]  ;;  %30 = vst.msk [vmem:[#allocation2 + $0x8] sm:$0xff] %vm28_vm1, %v275_v2  ;;  %29 = vst.msk [vmem:[#allocation2] sm:$0xff] %vm28_vm1, %v275_v2 }
   0x2   :  { %226 = vmatprep.subr.mxu0 %v42_v0  ;;  %v40_v3 = vld [vmem:[%s376_s2 + $0x28] sm:$0xff]  ;;  %v33_v4 = vld [vmem:[%s374_s0] sm:$0xff] }
   0x3   :  { %227 = vmatpush3.msra.mxu0 %v42_v0  ;;  %242 = vmatprep.mubr.msk.f32.mxu0 %vm43_vm0, %v33_v4 }
   0x4   :  { %228 = vmatprep.subr.mxu0 %v41_v1 }
   0x5   :  { %11 = vsyncpa [#allocation4], 0  ;;  %229 = vmatpush3.msra.mxu0 %v41_v1  ;;  %v39_v5 = vld [vmem:[%s376_s2 + $0x20] sm:$0xff]  ;;  %v38_v6 = vld [vmem:[%s376_s2 + $0x18] sm:$0xff]  ;;  %s276_s23 = smov [#allocation3]  }
   0x6   :  { %230 = vmatprep.subr.mxu0 %v40_v3  ;;  %v37_v7 = vld [vmem:[%s376_s2 + $0x10] sm:$0xff]  ;;  %v36_v8 = vld [vmem:[%s376_s2 + $0x8] sm:$0xff]  ;;  %v35_v9 = vld [vmem:[%s376_s2] sm:$0xff]  ;;  %s200_s24 = sshll.u32 %s276_s23, 4  ;;  %s201_s24 = int_to_ptr.vmem [resolvable:$true] %s200_s24 }
   0x7   :  { %231 = vmatpush3.msra.mxu0 %v40_v3  ;;  %v34_v10 = vld [vmem:[%s374_s0 + $0x8] sm:$0xff]  ;;  %v213_v17 = vld [vmem:[%s377_s3] ss:$0 sm:$0xff]  ;;  %s253_s25 = scalar_lea.vmem %s201_s24, 256  ;;  %p258_p1 = scmp.lt.s32.totalorder %s201_s24, %s201_s24 }
   0x8   :  { %232 = vmatprep.subr.mxu0 %v39_v5  ;;  %v32_v11 = vld [vmem:[#allocation2 + $0x8] sm:$0xff]  ;;  %v31_v13 = vld [vmem:[#allocation2] sm:$0xff]  ;;  %p254_p0 = scmp.ne.s32.totalorder %s201_s24, %s253_s25  ;;  %p259_p2 = scmp.lt.s32.totalorder %s253_s25, %s253_s25 }
   0x9   :  { %233 = vmatpush3.msra.mxu0 %v39_v5  ;;  %v144_v20 = vld [vmem:[%s375_s1] sm:$0xff]  ;;  %v145_v23 = vld [vmem:[%s375_s1 + $0x8] sm:$0xff] }
   0xa   :  { %234 = vmatprep.subr.mxu0 %v38_v6  ;;  %v214_v45 = vld [vmem:[%s378_s4] ss:$0 sm:$0xff]  ;;  %p260_p3 = por %p259_p2, %p258_p1 }
   0xb   :  { %235 = vmatpush3.msra.mxu0 %v38_v6  ;;  %v215_v47 = vld [vmem:[%s379_s5] ss:$0 sm:$0xff] }
   0xc   :  { %236 = vmatprep.subr.mxu0 %v37_v7  ;;  %p261_p4 = pnand %p260_p3, %p254_p0 }
   0xd   :  { %237 = vmatpush3.msra.mxu0 %v37_v7 }
   0xe   :  { %238 = vmatprep.subr.mxu0 %v36_v8 }
   0xf   :  { %239 = vmatpush3.msra.mxu0 %v36_v8 }
  0x10   :  { %240 = vmatprep.subr.mxu0 %v35_v9 }
  0x11   :  { %241 = vmatpush3.msra.mxu0 %v35_v9 }
  0x12   :  { %243 = vmatmul.mubr.msk.f32.vlgmr.msra.gmra.mxu0 %vm43_vm0, %v34_v10 }
  0xd2   :  { %v244_v12 = vpop.f32.mrf.mxu0 }
  0xd3   :  { %v126_v14 = vadd.f32 %v244_v12, %v32_v11 }
  0xd4   :  { %v116_v15 = vpop.f32.mrf.mxu0 }
  0xd5   :  { %129 = vst.msk [vmem:[#allocation2 + $0x8] sm:$0xff] %vm28_vm1, %v126_v14  ;;  %v125_v16 = vadd.f32 %v116_v15, %v31_v13 }
  0xd7   :  { %128 = vst.msk [vmem:[#allocation2] sm:$0xff] %vm28_vm1, %v125_v16 }
  0xdc   :  { %v134_v18 = vld [vmem:[#allocation2 + $0x8] sm:$0xff] }
  0xdd   :  { %v143_v22 = vadd.f32 %v213_v17, %v134_v18 }
  0xde   :  { %v133_v19 = vld [vmem:[#allocation2] sm:$0xff] }
  0xdf   :  { %v142_v21 = vadd.f32 %v213_v17, %v133_v19  ;;  %v147_v26 = vadd.f32 %v145_v23, %v143_v22 }
  0xe1   :  { %v146_v24 = vadd.f32 %v144_v20, %v142_v21  ;;  %v151_v27 = vsel %vm28_vm1, %v147_v26, 0.0 }
  0xe3   :  { %v148_v25 = vsel %vm28_vm1, %v146_v24, 0.0 }
  0xe4   :  { %149 = vadd.xlane.f32.xlu0 %v148_v25 }
  0xe8   :  { %152 = vadd.xlane.f32.xlu0 %v151_v27 }
 0x16d   :  { %v150_v28 = vpop.xlane.xlu0 %149 }
 0x16e   :  { %v155_v29 = vmul.f32 0.03125, %v150_v28 }
 0x170   :  { %v157_v30 = vsub.f32 %v146_v24, %v155_v29 }
 0x171   :  { %v153_v31 = vpop.xlane.xlu0 %152 }
 0x172   :  { %v156_v32 = vmul.f32 0.03125, %v153_v31  ;;  %v159_v33 = vmul.f32 %v157_v30, %v157_v30 }
 0x174   :  { %v158_v34 = vsub.f32 %v147_v26, %v156_v32  ;;  %v161_v35 = vsel %vm28_vm1, %v159_v33, 0.0 }
 0x175   :  { %162 = vadd.xlane.f32.xlu1 %v161_v35 }
 0x176   :  { %v160_v36 = vmul.f32 %v158_v34, %v158_v34 }
 0x178   :  { %v164_v37 = vsel %vm28_vm1, %v160_v36, 0.0 }
 0x179   :  { %165 = vadd.xlane.f32.xlu1 %v164_v37 }
 0x1fe   :  { %v163_v38 = vpop.xlane.xlu1 %162 }
 0x1ff   :  { %v167_v39 = vmul.f32 0.03125, %v163_v38 }
 0x201   :  { %v169_v40 = vadd.f32 1e-12, %v167_v39 }
 0x202   :  { %v166_v41 = vpop.xlane.xlu1 %165 }
 0x203   :  { %249 = vrsqrt.f32 %v169_v40  ;;  %v168_v42 = vmul.f32 0.03125, %v166_v41 }
 0x205   :  { %v170_v43 = vadd.f32 1e-12, %v168_v42 }
 0x207   :  { %251 = vrsqrt.f32 %v170_v43 }
 0x210   :  { %v250_v44 = vpop.eup %249 }
 0x211   :  { %v173_v46 = vmul.f32 %v250_v44, %v157_v30 }
 0x213   :  { %v182_v48 = vmul.f32 %v214_v45, %v173_v46 }
 0x214   :  { %v252_v49 = vpop.eup %251 }
 0x215   :  { %v174_v50 = vmul.f32 %v252_v49, %v158_v34  ;;  %v191_v51 = vadd.f32 %v215_v47, %v182_v48 }
 0x217   :  { %v183_v52 = vmul.f32 %v214_v45, %v174_v50  ;;  %193 = vst.msk [vmem:[#allocation3] sm:$0xff] %vm28_vm1, %v191_v51 }
 0x219   :  { %v192_v53 = vadd.f32 %v215_v47, %v183_v52 }
 0x21b   :  { %194 = vst.msk [vmem:[#allocation3 + $0x8] sm:$0xff] %vm28_vm1, %v192_v53 }
 0x21c   :  { %264 = shalt.err (!%p261_p4)
}
 0x21d   :  { %s277_s4 = smov 128   ;;  %s278_s5 = smov 8  }
 0x21e   :  { %206 = dma.vmem_to_hbm [thread:$0]  %s201_s24, 256, %s380_s6, [#allocation4], %s277_s4, %s277_s4, %s278_s5  }
 0x21f   :  { %273 = dma.done.wait [#allocation4], 256  }
 0x220   :  { %274 = vsyncadd [#allocation4], 4294967040 }
 0x221   :  { %210 = vsyncpa [#allocation4], 1 }

</bundles_post_ra>
